<compile_context>
chip_gen: v7x
topology: tpu7x:2x2x1
jax: 0.10.0
libtpu: 0.0.40
codegen_flags: <defaults>
</compile_context>

<pallas_src>
import functools

import jax
import jax.numpy as jnp
from jax.experimental import pallas as pl
from jax.experimental.pallas import tpu as pltpu

Z_DIM = 128
HIDDEN = 512
OUT_PAD = 128  # lane-dense padding for the final (512 -> 1) layer


def _round_up(x, m):
    return (x + m - 1) // m * m


def _sublane_multiple(dtype):
    # f32 -> 8, bf16 -> 16, int8/fp8 -> 32 (sublane packing).
    itemsize = jnp.dtype(dtype).itemsize
    return {4: 8, 2: 16, 1: 32}.get(itemsize, 8)


def _disc_kernel(x_ref,
                 w1_ref, b1_ref,
                 w2_ref, b2_ref,
                 w3_ref, b3_ref,
                 w4_ref, b4_ref,
                 w5_ref, b5_ref,
                 o_ref):
    """Fused 5-layer MLP: (tb, 128) -> (tb, OUT_PAD).

    MXU matmuls take bf16 operands and accumulate in f32; bias-add and ReLU
    are done in f32 on the VPU.  Only column 0 of the output is the logit.
    """

    def dense(h_f32, w_ref, b_ref):
        return jnp.dot(h_f32.astype(jnp.bfloat16), w_ref[...],
                       preferred_element_type=jnp.float32) + b_ref[...]

    h = x_ref[...].astype(jnp.float32)
    h = jnp.maximum(dense(h, w1_ref, b1_ref), 0.0)
    h = jnp.maximum(dense(h, w2_ref, b2_ref), 0.0)
    h = jnp.maximum(dense(h, w3_ref, b3_ref), 0.0)
    h = jnp.maximum(dense(h, w4_ref, b4_ref), 0.0)
    out = dense(h, w5_ref, b5_ref)  # (tb, OUT_PAD); only col 0 is real
    o_ref[...] = out.astype(o_ref.dtype)


def _kaiming_linear(key, fan_in, fan_out, dtype=jnp.float32):
    # torch.nn.init.kaiming_normal (fan_in mode, gain=sqrt(2)); bias = 0.
    std = (2.0 / fan_in) ** 0.5
    w = std * jax.random.normal(key, (fan_in, fan_out), dtype=dtype)
    b = jnp.zeros((1, fan_out), dtype=dtype)
    return w, b


def init_discriminator(key, z_dim=Z_DIM, hidden=HIDDEN, dtype=jnp.float32):
    dims = [(z_dim, hidden), (hidden, hidden), (hidden, hidden),
            (hidden, hidden), (hidden, 1)]
    keys = jax.random.split(key, len(dims))
    return [_kaiming_linear(k, fi, fo, dtype) for k, (fi, fo) in zip(keys, dims)]


@functools.partial(jax.jit, static_argnames=("max_block_b",))
def discriminator_forward(params, x, *, max_block_b=256):
    """Pallas forward of Discriminator: x (B, z_dim) -> logits (B, 1)."""
    (w1, b1), (w2, b2), (w3, b3), (w4, b4), (w5, b5) = params
    B, zd = x.shape

    # ---- batch tiling -------------------------------------------------
    sub = _sublane_multiple(x.dtype)
    Bp0 = _round_up(B, sub)
    tb = min(_round_up(max_block_b, sub), Bp0)
    # Ensure >= 2 grid steps when the batch allows it (v7x megacore sharding;
    # free on v5e/v6e which have a single TensorCore).
    if Bp0 > sub:
        tb = min(tb, _round_up(pl.cdiv(Bp0, 2), sub))
    Bp = _round_up(B, tb)
    if Bp != B:
        x = jnp.pad(x, ((0, Bp - B), (0, 0)))
    grid = (Bp // tb,)

    # ---- weight preparation (bf16 matmul operands, f32 biases) ---------
    w1b, w2b, w3b, w4b = (w.astype(jnp.bfloat16) for w in (w1, w2, w3, w4))
    # Lane-dense final layer: pad (512,1)->(512,128) and (1,1)->(1,128).
    w5b = jnp.pad(w5, ((0, 0), (0, OUT_PAD - w5.shape[1]))).astype(jnp.bfloat16)
    b5p = jnp.pad(b5, ((0, 0), (0, OUT_PAD - b5.shape[1]))).astype(jnp.float32)
    b1f, b2f, b3f, b4f = (b.astype(jnp.float32) for b in (b1, b2, b3, b4))

    weight_args = (w1b, b1f, w2b, b2f, w3b, b3f, w4b, b4f, w5b, b5p)
    # Constant index_map -> weights resident in VMEM; single-buffered since
    # they are never re-DMA'd (saves ~1.7 MiB of pointless double-buffer).
    weight_specs = [
        pl.BlockSpec(a.shape, lambda i: (0, 0), pipeline_mode=pl.Buffered(1))
        for a in weight_args
    ]

    out = pl.pallas_call(
        _disc_kernel,
        out_shape=jax.ShapeDtypeStruct((Bp, OUT_PAD), x.dtype),
        grid_spec=pltpu.PrefetchScalarGridSpec(
            num_scalar_prefetch=0,
            grid=grid,
            in_specs=[pl.BlockSpec((tb, zd), lambda i: (i, 0))] + weight_specs,
            out_specs=pl.BlockSpec((tb, OUT_PAD), lambda i: (i, 0)),
        ),
        compiler_params=pltpu.CompilerParams(
            # Batch tiles are independent -> megacore sharding on v7x.
            dimension_semantics=("parallel",),
        ),
    )(x, *weight_args)

    return out[:B, :1]


class Discriminator:
    """Mirror of the PyTorch Discriminator module."""

    def __init__(self, z_dim=Z_DIM, key=None, dtype=jnp.float32):
        if key is None:
            key = jax.random.PRNGKey(0)
        self.z_dim = z_dim
        self.params = init_discriminator(key, z_dim=z_dim, dtype=dtype)

    def __call__(self, x):
        return discriminator_forward(self.params, x)


def _reference_forward(params, x, compute_dtype=jnp.float32):
    """Pure-JAX reference.  compute_dtype controls the matmul operand dtype
    (f32 for the exact reference, bf16 to mimic the kernel's MXU path)."""
    (w1, b1), (w2, b2), (w3, b3), (w4, b4), (w5, b5) = params

    def dense(h, w, b):
        return jnp.dot(h.astype(compute_dtype), w.astype(compute_dtype),
                       preferred_element_type=jnp.float32) + b.astype(jnp.float32)

    h = jnp.maximum(dense(x, w1, b1), 0.0)
    h = jnp.maximum(dense(h, w2, b2), 0.0)
    h = jnp.maximum(dense(h, w3, b3), 0.0)
    h = jnp.maximum(dense(h, w4, b4), 0.0)
    return dense(h, w5, b5).astype(x.dtype)


if __name__ == "__main__":
    key = jax.random.PRNGKey(0)
    pkey, xkey = jax.random.split(key)

    batch = 16  # exercises the >=2 batch-tile (megacore) path
    dis = Discriminator(z_dim=Z_DIM, key=pkey)
    x = jax.random.normal(xkey, (batch, Z_DIM), dtype=jnp.float32)

    y = dis(x)
    y = jax.block_until_ready(y)

    assert y.shape == (batch, 1), y.shape
    assert y.dtype == x.dtype, y.dtype

    # Tight check against a bf16-matmul / f32-accum reference (same numerics
    # as the kernel) and a looser check against the exact f32 reference.
    ref_bf16 = _reference_forward(dis.params, x, compute_dtype=jnp.bfloat16)
    ref_f32 = _reference_forward(dis.params, x, compute_dtype=jnp.float32)
    err_bf16 = float(jnp.max(jnp.abs(y - ref_bf16)))
    err_f32 = float(jnp.max(jnp.abs(y - ref_f32)))
    assert jnp.allclose(y, ref_bf16, rtol=5e-3, atol=5e-3), err_bf16
    assert jnp.allclose(y, ref_f32, rtol=5e-2, atol=5e-2), err_f32

    print("KERNEL_OK")
</pallas_src>

<mosaic_0001>
module attributes {stable_mosaic.version = 11 : i64} {
  func.func @_disc_kernel(%arg0: i32, %arg1: memref<8x128xf32, #tpu.memory_space<vmem>>, %arg2: memref<128x512xbf16, #tpu.memory_space<vmem>>, %arg3: memref<1x512xf32, #tpu.memory_space<vmem>>, %arg4: memref<512x512xbf16, #tpu.memory_space<vmem>>, %arg5: memref<1x512xf32, #tpu.memory_space<vmem>>, %arg6: memref<512x512xbf16, #tpu.memory_space<vmem>>, %arg7: memref<1x512xf32, #tpu.memory_space<vmem>>, %arg8: memref<512x512xbf16, #tpu.memory_space<vmem>>, %arg9: memref<1x512xf32, #tpu.memory_space<vmem>>, %arg10: memref<512x128xbf16, #tpu.memory_space<vmem>>, %arg11: memref<1x128xf32, #tpu.memory_space<vmem>>, %arg12: memref<8x128xf32, #tpu.memory_space<vmem>>) attributes {dimension_semantics = [#tpu.dimension_semantics<parallel>], iteration_bounds = array<i64: 2>, scalar_prefetch = 0 : i64, scratch_operands = 0 : i64, tpu.core_type = #tpu.core_type<tc>, window_params = [{transform_indices = @transform_0, window_bounds = array<i64: 8, 128>}, {pipeline_mode = #tpu.pipeline_mode<synchronous>, transform_indices = @transform_1, window_bounds = array<i64: 128, 512>}, {pipeline_mode = #tpu.pipeline_mode<synchronous>, transform_indices = @transform_2, window_bounds = array<i64: 1, 512>}, {pipeline_mode = #tpu.pipeline_mode<synchronous>, transform_indices = @transform_3, window_bounds = array<i64: 512, 512>}, {pipeline_mode = #tpu.pipeline_mode<synchronous>, transform_indices = @transform_4, window_bounds = array<i64: 1, 512>}, {pipeline_mode = #tpu.pipeline_mode<synchronous>, transform_indices = @transform_5, window_bounds = array<i64: 512, 512>}, {pipeline_mode = #tpu.pipeline_mode<synchronous>, transform_indices = @transform_6, window_bounds = array<i64: 1, 512>}, {pipeline_mode = #tpu.pipeline_mode<synchronous>, transform_indices = @transform_7, window_bounds = array<i64: 512, 512>}, {pipeline_mode = #tpu.pipeline_mode<synchronous>, transform_indices = @transform_8, window_bounds = array<i64: 1, 512>}, {pipeline_mode = #tpu.pipeline_mode<synchronous>, transform_indices = @transform_9, window_bounds = array<i64: 512, 128>}, {pipeline_mode = #tpu.pipeline_mode<synchronous>, transform_indices = @transform_10, window_bounds = array<i64: 1, 128>}, {transform_indices = @transform_11, window_bounds = array<i64: 8, 128>}]} {
    %c0 = arith.constant 0 : index
    %c0_0 = arith.constant 0 : index
    %0 = vector.load %arg1[%c0, %c0_0] : memref<8x128xf32, #tpu.memory_space<vmem>>, vector<8x128xf32>
    %1 = arith.truncf %0 : vector<8x128xf32> to vector<8x128xbf16>
    %c0_1 = arith.constant 0 : index
    %c0_2 = arith.constant 0 : index
    %2 = vector.load %arg2[%c0_1, %c0_2] : memref<128x512xbf16, #tpu.memory_space<vmem>>, vector<128x512xbf16>
    %cst = arith.constant dense<0.000000e+00> : vector<8x512xf32>
    %3 = tpu.matmul %1, %2, %cst {dimension_numbers = #tpu.dot_dimension_numbers<[1], [0], [0], [1], [0, 0, 1, 1], [], []>} : vector<8x128xbf16>, vector<128x512xbf16>, vector<8x512xf32> -> vector<8x512xf32>
    %c0_3 = arith.constant 0 : index
    %c0_4 = arith.constant 0 : index
    %4 = vector.load %arg3[%c0_3, %c0_4] : memref<1x512xf32, #tpu.memory_space<vmem>>, vector<1x512xf32>
    %5 = vector.broadcast %4 : vector<1x512xf32> to vector<8x512xf32>
    %6 = arith.addf %3, %5 : vector<8x512xf32>
    %cst_5 = arith.constant 0.000000e+00 : f32
    %7 = vector.broadcast %cst_5 : f32 to vector<8x512xf32>
    %8 = arith.maximumf %6, %7 : vector<8x512xf32>
    %9 = arith.truncf %8 : vector<8x512xf32> to vector<8x512xbf16>
    %c0_6 = arith.constant 0 : index
    %c0_7 = arith.constant 0 : index
    %10 = vector.load %arg4[%c0_6, %c0_7] : memref<512x512xbf16, #tpu.memory_space<vmem>>, vector<512x512xbf16>
    %cst_8 = arith.constant dense<0.000000e+00> : vector<8x512xf32>
    %11 = tpu.matmul %9, %10, %cst_8 {dimension_numbers = #tpu.dot_dimension_numbers<[1], [0], [0], [1], [0, 0, 1, 1], [], []>} : vector<8x512xbf16>, vector<512x512xbf16>, vector<8x512xf32> -> vector<8x512xf32>
    %c0_9 = arith.constant 0 : index
    %c0_10 = arith.constant 0 : index
    %12 = vector.load %arg5[%c0_9, %c0_10] : memref<1x512xf32, #tpu.memory_space<vmem>>, vector<1x512xf32>
    %13 = vector.broadcast %12 : vector<1x512xf32> to vector<8x512xf32>
    %14 = arith.addf %11, %13 : vector<8x512xf32>
    %cst_11 = arith.constant 0.000000e+00 : f32
    %15 = vector.broadcast %cst_11 : f32 to vector<8x512xf32>
    %16 = arith.maximumf %14, %15 : vector<8x512xf32>
    %17 = arith.truncf %16 : vector<8x512xf32> to vector<8x512xbf16>
    %c0_12 = arith.constant 0 : index
    %c0_13 = arith.constant 0 : index
    %18 = vector.load %arg6[%c0_12, %c0_13] : memref<512x512xbf16, #tpu.memory_space<vmem>>, vector<512x512xbf16>
    %cst_14 = arith.constant dense<0.000000e+00> : vector<8x512xf32>
    %19 = tpu.matmul %17, %18, %cst_14 {dimension_numbers = #tpu.dot_dimension_numbers<[1], [0], [0], [1], [0, 0, 1, 1], [], []>} : vector<8x512xbf16>, vector<512x512xbf16>, vector<8x512xf32> -> vector<8x512xf32>
    %c0_15 = arith.constant 0 : index
    %c0_16 = arith.constant 0 : index
    %20 = vector.load %arg7[%c0_15, %c0_16] : memref<1x512xf32, #tpu.memory_space<vmem>>, vector<1x512xf32>
    %21 = vector.broadcast %20 : vector<1x512xf32> to vector<8x512xf32>
    %22 = arith.addf %19, %21 : vector<8x512xf32>
    %cst_17 = arith.constant 0.000000e+00 : f32
    %23 = vector.broadcast %cst_17 : f32 to vector<8x512xf32>
    %24 = arith.maximumf %22, %23 : vector<8x512xf32>
    %25 = arith.truncf %24 : vector<8x512xf32> to vector<8x512xbf16>
    %c0_18 = arith.constant 0 : index
    %c0_19 = arith.constant 0 : index
    %26 = vector.load %arg8[%c0_18, %c0_19] : memref<512x512xbf16, #tpu.memory_space<vmem>>, vector<512x512xbf16>
    %cst_20 = arith.constant dense<0.000000e+00> : vector<8x512xf32>
    %27 = tpu.matmul %25, %26, %cst_20 {dimension_numbers = #tpu.dot_dimension_numbers<[1], [0], [0], [1], [0, 0, 1, 1], [], []>} : vector<8x512xbf16>, vector<512x512xbf16>, vector<8x512xf32> -> vector<8x512xf32>
    %c0_21 = arith.constant 0 : index
    %c0_22 = arith.constant 0 : index
    %28 = vector.load %arg9[%c0_21, %c0_22] : memref<1x512xf32, #tpu.memory_space<vmem>>, vector<1x512xf32>
    %29 = vector.broadcast %28 : vector<1x512xf32> to vector<8x512xf32>
    %30 = arith.addf %27, %29 : vector<8x512xf32>
    %cst_23 = arith.constant 0.000000e+00 : f32
    %31 = vector.broadcast %cst_23 : f32 to vector<8x512xf32>
    %32 = arith.maximumf %30, %31 : vector<8x512xf32>
    %33 = arith.truncf %32 : vector<8x512xf32> to vector<8x512xbf16>
    %c0_24 = arith.constant 0 : index
    %c0_25 = arith.constant 0 : index
    %34 = vector.load %arg10[%c0_24, %c0_25] : memref<512x128xbf16, #tpu.memory_space<vmem>>, vector<512x128xbf16>
    %cst_26 = arith.constant dense<0.000000e+00> : vector<8x128xf32>
    %35 = tpu.matmul %33, %34, %cst_26 {dimension_numbers = #tpu.dot_dimension_numbers<[1], [0], [0], [1], [0, 0, 1, 1], [], []>} : vector<8x512xbf16>, vector<512x128xbf16>, vector<8x128xf32> -> vector<8x128xf32>
    %c0_27 = arith.constant 0 : index
    %c0_28 = arith.constant 0 : index
    %36 = vector.load %arg11[%c0_27, %c0_28] : memref<1x128xf32, #tpu.memory_space<vmem>>, vector<1x128xf32>
    %37 = vector.broadcast %36 : vector<1x128xf32> to vector<8x128xf32>
    %38 = arith.addf %35, %37 : vector<8x128xf32>
    %c0_29 = arith.constant 0 : index
    %c0_30 = arith.constant 0 : index
    %39 = vector.load %arg12[%c0_29, %c0_30] : memref<8x128xf32, #tpu.memory_space<vmem>>, vector<8x128xf32>
    tpu.vector_store %arg12[%c0_29, %c0_30], %38 {strides = array<i32>} : memref<8x128xf32, #tpu.memory_space<vmem>>, vector<8x128xf32>,
    return
  }
  func.func @transform_0(%arg0: i32) -> (i32, i32) {
    %c0_i32 = arith.constant 0 : i32
    %c0_i32_0 = arith.constant 0 : i32
    return %arg0, %c0_i32 : i32, i32
  }
  func.func @transform_1(%arg0: i32) -> (i32, i32) {
    %c0_i32 = arith.constant 0 : i32
    %c0_i32_0 = arith.constant 0 : i32
    %c0_i32_1 = arith.constant 0 : i32
    return %c0_i32, %c0_i32_0 : i32, i32
  }
  func.func @transform_2(%arg0: i32) -> (i32, i32) {
    %c0_i32 = arith.constant 0 : i32
    %c0_i32_0 = arith.constant 0 : i32
    %c0_i32_1 = arith.constant 0 : i32
    return %c0_i32, %c0_i32_0 : i32, i32
  }
  func.func @transform_3(%arg0: i32) -> (i32, i32) {
    %c0_i32 = arith.constant 0 : i32
    %c0_i32_0 = arith.constant 0 : i32
    %c0_i32_1 = arith.constant 0 : i32
    return %c0_i32, %c0_i32_0 : i32, i32
  }
  func.func @transform_4(%arg0: i32) -> (i32, i32) {
    %c0_i32 = arith.constant 0 : i32
    %c0_i32_0 = arith.constant 0 : i32
    %c0_i32_1 = arith.constant 0 : i32
    return %c0_i32, %c0_i32_0 : i32, i32
  }
  func.func @transform_5(%arg0: i32) -> (i32, i32) {
    %c0_i32 = arith.constant 0 : i32
    %c0_i32_0 = arith.constant 0 : i32
    %c0_i32_1 = arith.constant 0 : i32
    return %c0_i32, %c0_i32_0 : i32, i32
  }
  func.func @transform_6(%arg0: i32) -> (i32, i32) {
    %c0_i32 = arith.constant 0 : i32
    %c0_i32_0 = arith.constant 0 : i32
    %c0_i32_1 = arith.constant 0 : i32
    return %c0_i32, %c0_i32_0 : i32, i32
  }
  func.func @transform_7(%arg0: i32) -> (i32, i32) {
    %c0_i32 = arith.constant 0 : i32
    %c0_i32_0 = arith.constant 0 : i32
    %c0_i32_1 = arith.constant 0 : i32
    return %c0_i32, %c0_i32_0 : i32, i32
  }
  func.func @transform_8(%arg0: i32) -> (i32, i32) {
    %c0_i32 = arith.constant 0 : i32
    %c0_i32_0 = arith.constant 0 : i32
    %c0_i32_1 = arith.constant 0 : i32
    return %c0_i32, %c0_i32_0 : i32, i32
  }
  func.func @transform_9(%arg0: i32) -> (i32, i32) {
    %c0_i32 = arith.constant 0 : i32
    %c0_i32_0 = arith.constant 0 : i32
    %c0_i32_1 = arith.constant 0 : i32
    return %c0_i32, %c0_i32_0 : i32, i32
  }
  func.func @transform_10(%arg0: i32) -> (i32, i32) {
    %c0_i32 = arith.constant 0 : i32
    %c0_i32_0 = arith.constant 0 : i32
    %c0_i32_1 = arith.constant 0 : i32
    return %c0_i32, %c0_i32_0 : i32, i32
  }
  func.func @transform_11(%arg0: i32) -> (i32, i32) {
    %c0_i32 = arith.constant 0 : i32
    %c0_i32_0 = arith.constant 0 : i32
    return %arg0, %c0_i32 : i32, i32
  }
}

</mosaic_0001>

<bundles_post_ra>
// kernel: discriminator_forward.1
= control target key start
LH: loop header
LB: loop body
LE: loop exit
PB: predicated region body
PF: predicated region fallthrough
CT: control target
= control target key end

     0   :  { %s5244_s17 = smov 0   ;;  %s6688_s0 = inlined_call_operand.vmem [shape: f32[16,128], index: 0, kind: input, shape index: {}]   ;;  %s6689_s1 = inlined_call_operand.vmem [shape: bf16[128,512], index: 1, kind: input, shape index: {}]   ;;  %s6690_s2 = inlined_call_operand.vmem [shape: f32[1,512], index: 2, kind: input, shape index: {}]   ;;  %s6691_s3 = inlined_call_operand.vmem [shape: bf16[512,512], index: 3, kind: input, shape index: {}]   ;;  %s6692_s4 = inlined_call_operand.vmem [shape: f32[1,512], index: 4, kind: input, shape index: {}]   ;;  %s6693_s5 = inlined_call_operand.vmem [shape: bf16[512,512], index: 5, kind: input, shape index: {}]   ;;  %s6694_s6 = inlined_call_operand.vmem [shape: f32[1,512], index: 6, kind: input, shape index: {}]   ;;  %s6695_s7 = inlined_call_operand.vmem [shape: bf16[512,512], index: 7, kind: input, shape index: {}]   ;;  %s6696_s8 = inlined_call_operand.vmem [shape: f32[1,512], index: 8, kind: input, shape index: {}]   ;;  %s6697_s9 = inlined_call_operand.vmem [shape: bf16[512,128], index: 9, kind: input, shape index: {}]   ;;  %s6698_s10 = inlined_call_operand.vmem [shape: f32[1,128], index: 10, kind: input, shape index: {}]   ;;  %s6699_s11 = inlined_call_operand.vmem [shape: f32[16,128], index: 11, kind: output, shape index: {}]  }
   0x1 LB: > { %s3972_s18 = sadd.s32 4294967295, %s5181_s17   ;;  %p3976_p0 = scmp.ge.s32.totalorder %s5181_s17, 1  ;;  %s5181_s17 = sphi %s5244_s17, %s21_s17  }
   0x2   : > { %p336_p1 = scmp.lt.s32.totalorder %s5181_s17, 3 }
   0x4   : > { %p337_p2 = pnand %p3976_p0, %p336_p1 }
   0x5   : > { %v4519_v0 = vld [vmem:[%s6689_s1 + $0x4] ss:$16 sps:$4 sm:$0xff] (!%p337_p2)   ;;  %v4521_v1 = vld [vmem:[%s6689_s1] ss:$16 sps:$4 sm:$0xff] (!%p337_p2)   ;;  %v5183_v2 = vmov (!%p337_p2), 0   ;;  %p374_p3 = scmp.lt.s32.totalorder (!%p337_p2), %s3972_s18, 1 }
   0x6   : > { %340 = sbr.rel (%p337_p2) target bundleno = 1331 (0x533), region = 64  ;;  %631 = vmatprep.mubr.bf16.mxu0 (!%p337_p2), %v5183_v2  ;;  %672 = vmatprep.mubr.bf16.mxu1 (!%p337_p2), %v5183_v2  ;;  %v4522_v3 = vld [vmem:[%s6689_s1 + $0x24] ss:$16 sps:$4 sm:$0xff] (!%p337_p2)   ;;  %v4524_v4 = vld [vmem:[%s6689_s1 + $0x20] ss:$16 sps:$4 sm:$0xff] (!%p337_p2)  }
   0x7   : > { %599 = vmatprep.subr.bf16.mxu0 (!%p337_p2), %v4519_v0  ;;  %v4525_v5 = vld [vmem:[%s6689_s1 + $0x44] ss:$16 sps:$4 sm:$0xff] (!%p337_p2)   ;;  %v4527_v6 = vld [vmem:[%s6689_s1 + $0x40] ss:$16 sps:$4 sm:$0xff] (!%p337_p2)   ;;  %v4543_v10 = vld [vmem:[%s6689_s1 + $0xc] ss:$16 sps:$4 sm:$0xff] (!%p337_p2)  }
   0x8   : > { %600 = vmatpush1.bf16.msra.mxu0 (!%p337_p2), %v4521_v1  ;;  %v4528_v7 = vld [vmem:[%s6689_s1 + $0x64] ss:$16 sps:$4 sm:$0xff] (!%p337_p2)   ;;  %v4530_v8 = vld [vmem:[%s6689_s1 + $0x60] ss:$16 sps:$4 sm:$0xff] (!%p337_p2)   ;;  %v4545_v11 = vld [vmem:[%s6689_s1 + $0x8] ss:$16 sps:$4 sm:$0xff] (!%p337_p2)   ;;  %640 = vmatprep.subr.bf16.mxu1 (!%p337_p2), %v4543_v10 }
   0x9   : > { %601 = vmatprep.subr.bf16.mxu0 (!%p337_p2), %v4522_v3  ;;  %v4531_v9 = vld [vmem:[%s6689_s1 + $0x84] ss:$16 sps:$4 sm:$0xff] (!%p337_p2)   ;;  %v4546_v12 = vld [vmem:[%s6689_s1 + $0x2c] ss:$16 sps:$4 sm:$0xff] (!%p337_p2)   ;;  %v4533_v13 = vld [vmem:[%s6689_s1 + $0x80] ss:$16 sps:$4 sm:$0xff] (!%p337_p2)   ;;  %641 = vmatpush1.bf16.msra.mxu1 (!%p337_p2), %v4545_v11 }
   0xa   : > { %v4548_v14 = vld [vmem:[%s6689_s1 + $0x28] ss:$16 sps:$4 sm:$0xff] (!%p337_p2)   ;;  %642 = vmatprep.subr.bf16.mxu1 (!%p337_p2), %v4546_v12  ;;  %v4549_v15 = vld [vmem:[%s6689_s1 + $0x4c] ss:$16 sps:$4 sm:$0xff] (!%p337_p2)   ;;  %v4534_v16 = vld [vmem:[%s6689_s1 + $0xa4] ss:$16 sps:$4 sm:$0xff] (!%p337_p2)  }
   0xb   : > { %v4536_v17 = vld [vmem:[%s6689_s1 + $0xa0] ss:$16 sps:$4 sm:$0xff] (!%p337_p2)   ;;  %v4551_v18 = vld [vmem:[%s6689_s1 + $0x48] ss:$16 sps:$4 sm:$0xff] (!%p337_p2)   ;;  %v4552_v19 = vld [vmem:[%s6689_s1 + $0x6c] ss:$16 sps:$4 sm:$0xff] (!%p337_p2)  }
   0xc   : > { %602 = vmatpush1.bf16.msra.mxu0 (!%p337_p2), %v4524_v4  ;;  %v4537_v20 = vld [vmem:[%s6689_s1 + $0xc4] ss:$16 sps:$4 sm:$0xff] (!%p337_p2)   ;;  %v4539_v21 = vld [vmem:[%s6689_s1 + $0xc0] ss:$16 sps:$4 sm:$0xff] (!%p337_p2)   ;;  %v4554_v22 = vld [vmem:[%s6689_s1 + $0x68] ss:$16 sps:$4 sm:$0xff] (!%p337_p2)  }
   0xd   : > { %603 = vmatprep.subr.bf16.mxu0 %v4525_v5  ;;  %s6701_s18 = smov (!%p374_p3, %s3972_s18), 1  ;;  %643 = vmatpush1.bf16.msra.mxu1 %v4548_v14  ;;  %v4555_v23 = vld [vmem:[%s6689_s1 + $0x8c] ss:$16 sps:$4 sm:$0xff]   ;;  %v4540_v24 = vld [vmem:[%s6689_s1 + $0xe4] ss:$16 sps:$4 sm:$0xff]  }
   0xe   : > { %644 = vmatprep.subr.bf16.mxu1 %v4549_v15  ;;  %s3977_s25 = sshll.u32 %s6701_s18, 3  ;;  %v4542_v25 = vld [vmem:[%s6689_s1 + $0xe0] ss:$16 sps:$4 sm:$0xff]   ;;  %v4557_v27 = vld [vmem:[%s6689_s1 + $0x88] ss:$16 sps:$4 sm:$0xff]  }
   0xf   : > { %s377_s13 = scalar_lea.vmem %s6688_s0, %s3977_s25  ;;  %v4558_v28 = vld [vmem:[%s6689_s1 + $0xac] ss:$16 sps:$4 sm:$0xff]   ;;  %v4569_v29 = vld [vmem:[%s6691_s3 + $0x4] ss:$16 sps:$4 sm:$0xff]   ;;  %v4560_v31 = vld [vmem:[%s6689_s1 + $0xa8] ss:$16 sps:$4 sm:$0xff]   ;;  %s381_s14 = scalar_lea.vmem %s6699_s11, %s3977_s25 }
  0x10   : > { %604 = vmatpush1.bf16.msra.mxu0 %v4527_v6  ;;  %v383_v26 = vld [vmem:[%s377_s13] sm:$0xff]  ;;  %v4561_v32 = vld [vmem:[%s6689_s1 + $0xcc] ss:$16 sps:$4 sm:$0xff]   ;;  %v4563_v35 = vld [vmem:[%s6689_s1 + $0xc8] ss:$16 sps:$4 sm:$0xff]  }
  0x11   : > { %605 = vmatprep.subr.bf16.mxu0 %v4528_v7  ;;  %645 = vmatpush1.bf16.msra.mxu1 %v4551_v18  ;;  %v384_v30 = vpack.c.bf16 %v383_v26, %v383_v26  ;;  %v4567_v33 = vld [vmem:[%s6691_s3] ss:$16 sps:$4 sm:$0xff]   ;;  %v4575_v34 = vld [vmem:[%s6691_s3 + $0x24] ss:$16 sps:$4 sm:$0xff]   ;;  %v4564_v36 = vld [vmem:[%s6689_s1 + $0xec] ss:$16 sps:$4 sm:$0xff]  }
  0x12   : > { %646 = vmatprep.subr.bf16.mxu1 %v4552_v19  ;;  %v4573_v37 = vld [vmem:[%s6691_s3 + $0x20] ss:$16 sps:$4 sm:$0xff]   ;;  %v4581_v38 = vld [vmem:[%s6691_s3 + $0x44] ss:$16 sps:$4 sm:$0xff]   ;;  %v4566_v39 = vld [vmem:[%s6689_s1 + $0xe8] ss:$16 sps:$4 sm:$0xff]  }
  0x13   : > { %v4572_v40 = vld [vmem:[%s6691_s3 + $0xc] ss:$16 sps:$4 sm:$0xff]   ;;  %v4579_v41 = vld [vmem:[%s6691_s3 + $0x40] ss:$16 sps:$4 sm:$0xff]   ;;  %v4587_v42 = vld [vmem:[%s6691_s3 + $0x64] ss:$16 sps:$4 sm:$0xff]  }
  0x14   : > { %606 = vmatpush1.bf16.msra.mxu0 %v4530_v8  ;;  %v4570_v43 = vld [vmem:[%s6691_s3 + $0x8] ss:$16 sps:$4 sm:$0xff]   ;;  %v4578_v44 = vld [vmem:[%s6691_s3 + $0x2c] ss:$16 sps:$4 sm:$0xff]   ;;  %v4585_v45 = vld [vmem:[%s6691_s3 + $0x60] ss:$16 sps:$4 sm:$0xff]  }
  0x15   : > { %607 = vmatprep.subr.bf16.mxu0 %v4531_v9  ;;  %647 = vmatpush1.bf16.msra.mxu1 %v4554_v22  ;;  %v4593_v46 = vld [vmem:[%s6691_s3 + $0x84] ss:$16 sps:$4 sm:$0xff]   ;;  %v4576_v47 = vld [vmem:[%s6691_s3 + $0x28] ss:$16 sps:$4 sm:$0xff]   ;;  %v4584_v48 = vld [vmem:[%s6691_s3 + $0x4c] ss:$16 sps:$4 sm:$0xff]  }
  0x16   : > { %648 = vmatprep.subr.bf16.mxu1 %v4555_v23  ;;  %v4591_v49 = vld [vmem:[%s6691_s3 + $0x80] ss:$16 sps:$4 sm:$0xff]   ;;  %v4599_v50 = vld [vmem:[%s6691_s3 + $0xa4] ss:$16 sps:$4 sm:$0xff]   ;;  %v4582_v51 = vld [vmem:[%s6691_s3 + $0x48] ss:$16 sps:$4 sm:$0xff]  }
  0x17   : > { %v4590_v52 = vld [vmem:[%s6691_s3 + $0x6c] ss:$16 sps:$4 sm:$0xff]   ;;  %v4597_v53 = vld [vmem:[%s6691_s3 + $0xa0] ss:$16 sps:$4 sm:$0xff]   ;;  %v4605_v54 = vld [vmem:[%s6691_s3 + $0xc4] ss:$16 sps:$4 sm:$0xff]  }
  0x18   : > { %608 = vmatpush1.bf16.msra.mxu0 %v4533_v13  ;;  %v4588_v55 = vld [vmem:[%s6691_s3 + $0x68] ss:$16 sps:$4 sm:$0xff]   ;;  %v4596_v56 = vld [vmem:[%s6691_s3 + $0x8c] ss:$16 sps:$4 sm:$0xff]   ;;  %v4603_v57 = vld [vmem:[%s6691_s3 + $0xc0] ss:$16 sps:$4 sm:$0xff]  }
  0x19   : > { %609 = vmatprep.subr.bf16.mxu0 %v4534_v16  ;;  %649 = vmatpush1.bf16.msra.mxu1 %v4557_v27  ;;  %v4611_v58 = vld [vmem:[%s6691_s3 + $0xe4] ss:$16 sps:$4 sm:$0xff]   ;;  %v4594_v59 = vld [vmem:[%s6691_s3 + $0x88] ss:$16 sps:$4 sm:$0xff]   ;;  %v4602_v60 = vld [vmem:[%s6691_s3 + $0xac] ss:$16 sps:$4 sm:$0xff]  }
  0x1a   : > { %650 = vmatprep.subr.bf16.mxu1 %v4558_v28  ;;  %v4609_v61 = vld [vmem:[%s6691_s3 + $0xe0] ss:$16 sps:$4 sm:$0xff]   ;;  %v4617_v62 = vld [vmem:[%s6691_s3 + $0x104] ss:$16 sps:$4 sm:$0xff]   ;;  %v4600_v63 = vld [vmem:[%s6691_s3 + $0xa8] ss:$16 sps:$4 sm:$0xff]  }
  0x1b   : > { %v4608_v0 = vld [vmem:[%s6691_s3 + $0xcc] ss:$16 sps:$4 sm:$0xff]   ;;  %v4615_v1 = vld [vmem:[%s6691_s3 + $0x100] ss:$16 sps:$4 sm:$0xff]   ;;  %v4623_v2 = vld [vmem:[%s6691_s3 + $0x124] ss:$16 sps:$4 sm:$0xff]  }
  0x1c   : > { %610 = vmatpush1.bf16.msra.mxu0 %v4536_v17  ;;  %v4606_v3 = vld [vmem:[%s6691_s3 + $0xc8] ss:$16 sps:$4 sm:$0xff]   ;;  %v4614_v4 = vld [vmem:[%s6691_s3 + $0xec] ss:$16 sps:$4 sm:$0xff]   ;;  %v4621_v5 = vld [vmem:[%s6691_s3 + $0x120] ss:$16 sps:$4 sm:$0xff]  }
  0x1d   : > { %611 = vmatprep.subr.bf16.mxu0 %v4537_v20  ;;  %651 = vmatpush1.bf16.msra.mxu1 %v4560_v31  ;;  %v4629_v6 = vld [vmem:[%s6691_s3 + $0x144] ss:$16 sps:$4 sm:$0xff]   ;;  %v4612_v7 = vld [vmem:[%s6691_s3 + $0xe8] ss:$16 sps:$4 sm:$0xff]   ;;  %v4620_v8 = vld [vmem:[%s6691_s3 + $0x10c] ss:$16 sps:$4 sm:$0xff]  }
  0x1e   : > { %652 = vmatprep.subr.bf16.mxu1 %v4561_v32  ;;  %v4627_v9 = vld [vmem:[%s6691_s3 + $0x140] ss:$16 sps:$4 sm:$0xff]   ;;  %v4635_v10 = vld [vmem:[%s6691_s3 + $0x164] ss:$16 sps:$4 sm:$0xff]   ;;  %v4618_v11 = vld [vmem:[%s6691_s3 + $0x108] ss:$16 sps:$4 sm:$0xff]  }
  0x1f   : > { %v4626_v12 = vld [vmem:[%s6691_s3 + $0x12c] ss:$16 sps:$4 sm:$0xff]   ;;  %v4633_v13 = vld [vmem:[%s6691_s3 + $0x160] ss:$16 sps:$4 sm:$0xff]   ;;  %v4641_v14 = vld [vmem:[%s6691_s3 + $0x184] ss:$16 sps:$4 sm:$0xff]  }
  0x20   : > { %612 = vmatpush1.bf16.msra.mxu0 %v4539_v21  ;;  %v4624_v15 = vld [vmem:[%s6691_s3 + $0x128] ss:$16 sps:$4 sm:$0xff]   ;;  %v4632_v16 = vld [vmem:[%s6691_s3 + $0x14c] ss:$16 sps:$4 sm:$0xff]   ;;  %v4639_v17 = vld [vmem:[%s6691_s3 + $0x180] ss:$16 sps:$4 sm:$0xff]  }
  0x21   : > { %613 = vmatprep.subr.bf16.mxu0 %v4540_v24  ;;  %653 = vmatpush1.bf16.msra.mxu1 %v4563_v35  ;;  %v4647_v18 = vld [vmem:[%s6691_s3 + $0x1a4] ss:$16 sps:$4 sm:$0xff]   ;;  %v4630_v19 = vld [vmem:[%s6691_s3 + $0x148] ss:$16 sps:$4 sm:$0xff]   ;;  %v4638_v20 = vld [vmem:[%s6691_s3 + $0x16c] ss:$16 sps:$4 sm:$0xff]  }
  0x22   : > { %654 = vmatprep.subr.bf16.mxu1 %v4564_v36  ;;  %v4645_v21 = vld [vmem:[%s6691_s3 + $0x1a0] ss:$16 sps:$4 sm:$0xff]   ;;  %v4636_v22 = vld [vmem:[%s6691_s3 + $0x168] ss:$16 sps:$4 sm:$0xff]   ;;  %v4644_v23 = vld [vmem:[%s6691_s3 + $0x18c] ss:$16 sps:$4 sm:$0xff]  }
  0x23   : > { %v4642_v24 = vld [vmem:[%s6691_s3 + $0x188] ss:$16 sps:$4 sm:$0xff]   ;;  %v4653_v27 = vld [vmem:[%s6691_s3 + $0x1c4] ss:$16 sps:$4 sm:$0xff]   ;;  %v4656_v28 = vld [vmem:[%s6691_s3 + $0x1cc] ss:$16 sps:$4 sm:$0xff]  }
  0x24   : > { %614 = vmatpush1.bf16.msra.mxu0 %v4542_v25  ;;  %v4650_v25 = vld [vmem:[%s6691_s3 + $0x1ac] ss:$16 sps:$4 sm:$0xff]   ;;  %v4648_v26 = vld [vmem:[%s6691_s3 + $0x1a8] ss:$16 sps:$4 sm:$0xff]   ;;  %v4659_v31 = vld [vmem:[%s6691_s3 + $0x1e4] ss:$16 sps:$4 sm:$0xff]  }
  0x25   : > { %1479 = vmatprep.subr.bf16.mxu0 %v4569_v29  ;;  %655 = vmatpush1.bf16.msra.mxu1 %v4566_v39  ;;  %v4651_v29 = vld [vmem:[%s6691_s3 + $0x1c0] ss:$16 sps:$4 sm:$0xff]   ;;  %v4662_v32 = vld [vmem:[%s6691_s3 + $0x1ec] ss:$16 sps:$4 sm:$0xff]   ;;  %v4665_v35 = vld [vmem:[%s6691_s3 + $0x204] ss:$16 sps:$4 sm:$0xff]  }
  0x26   : > { %1561 = vmatprep.subr.bf16.mxu1 %v4572_v40  ;;  %v4668_v36 = vld [vmem:[%s6691_s3 + $0x20c] ss:$16 sps:$4 sm:$0xff]   ;;  %v5566_v40 = vld [vmem:[%s6690_s2] sm:$0xf] }
  0x27   : > { %632 = vmatmul.mubr.bf16.vlgmr.msra.gmra.mrb[0].mxu0 %v384_v30 }
  0x28   : > { %1480 = vmatpush1.bf16.msra.mxu0 %v4567_v33  ;;  %673 = vmatmul.mubr.bf16.vlgmr.msra.gmra.mrb[0].mxu1 %v384_v30  ;;  %v4654_v30 = vld [vmem:[%s6691_s3 + $0x1c8] ss:$16 sps:$4 sm:$0xff]   ;;  %v4657_v33 = vld [vmem:[%s6691_s3 + $0x1e0] ss:$16 sps:$4 sm:$0xff]  }
  0x29   : > { %1481 = vmatprep.subr.bf16.mxu0 %v4575_v34  ;;  %1562 = vmatpush1.bf16.msra.mxu1 %v4570_v43  ;;  %v4660_v34 = vld [vmem:[%s6691_s3 + $0x1e8] ss:$16 sps:$4 sm:$0xff]  }
  0x2a   : > { %1563 = vmatprep.subr.bf16.mxu1 %v4578_v44 }
  0x2c   : > { %1482 = vmatpush1.bf16.msra.mxu0 %v4573_v37  ;;  %v419_v37 = vlaneseq }
  0x2d   : > { %1483 = vmatprep.subr.bf16.mxu0 %v4581_v38  ;;  %1564 = vmatpush1.bf16.msra.mxu1 %v4576_v47 }
  0x2e   : > { %1565 = vmatprep.subr.bf16.mxu1 %v4584_v48  ;;  %v5558_v38 = vshrl.u32 %v419_v37, 7  ;;  %v4725_v37 = vld [vmem:[%s6691_s3 + $0x344] ss:$16 sps:$4 sm:$0xff]  }
  0x30   : > { %1484 = vmatpush1.bf16.msra.mxu0 %v4579_v41  ;;  %v5561_v39 = vsub.s32 0, %v5558_v38  ;;  %v5569_v41 = vsub.s32 1, %v5558_v38 }
  0x31   : > { %1485 = vmatprep.subr.bf16.mxu0 %v4587_v42  ;;  %1566 = vmatpush1.bf16.msra.mxu1 %v4582_v51 }
  0x32   : > { %1567 = vmatprep.subr.bf16.mxu1 %v4590_v52  ;;  %v422_v42 = vrot.slane %v5566_v40, %v5561_v39  ;;  %v426_v43 = vrot.slane %v5566_v40, %v5569_v41  ;;  %v5576_v52 = vsub.s32 3, %v5558_v38 }
  0x34   : > { %1486 = vmatpush1.bf16.msra.mxu0 %v4585_v45 }
  0x35   : > { %1487 = vmatprep.subr.bf16.mxu0 %v4593_v46  ;;  %1568 = vmatpush1.bf16.msra.mxu1 %v4588_v55  ;;  %v4666_v55 = vld [vmem:[%s6691_s3 + $0x208] ss:$16 sps:$4 sm:$0xff]  }
  0x36   : > { %1569 = vmatprep.subr.bf16.mxu1 %v4596_v56 }
  0x38   : > { %1488 = vmatpush1.bf16.msra.mxu0 %v4591_v49 }
  0x39   : > { %1489 = vmatprep.subr.bf16.mxu0 %v4599_v50  ;;  %1570 = vmatpush1.bf16.msra.mxu1 %v4594_v59  ;;  %v434_v59 = vrot.slane %v5566_v40, %v5576_v52 }
  0x3a   : > { %1571 = vmatprep.subr.bf16.mxu1 %v4602_v60  ;;  %v4669_v60 = vld [vmem:[%s6691_s3 + $0x220] ss:$16 sps:$4 sm:$0xff]  }
  0x3c   : > { %1490 = vmatpush1.bf16.msra.mxu0 %v4597_v53 }
  0x3d   : > { %1491 = vmatprep.subr.bf16.mxu0 %v4605_v54  ;;  %1572 = vmatpush1.bf16.msra.mxu1 %v4600_v63  ;;  %v4663_v54 = vld [vmem:[%s6691_s3 + $0x200] ss:$16 sps:$4 sm:$0xff]   ;;  %v4680_v63 = vld [vmem:[%s6691_s3 + $0x24c] ss:$16 sps:$4 sm:$0xff]  }
  0x3e   : > { %1573 = vmatprep.subr.bf16.mxu1 %v4608_v0 }
  0x40   : > { %1492 = vmatpush1.bf16.msra.mxu0 %v4603_v57  ;;  %v4671_v57 = vld [vmem:[%s6691_s3 + $0x224] ss:$16 sps:$4 sm:$0xff]  }
  0x41   : > { %1493 = vmatprep.subr.bf16.mxu0 %v4611_v58  ;;  %1574 = vmatpush1.bf16.msra.mxu1 %v4606_v3  ;;  %v4674_v58 = vld [vmem:[%s6691_s3 + $0x22c] ss:$16 sps:$4 sm:$0xff]  }
  0x42   : > { %1575 = vmatprep.subr.bf16.mxu1 %v4614_v4  ;;  %v4675_v4 = vld [vmem:[%s6691_s3 + $0x240] ss:$16 sps:$4 sm:$0xff]  }
  0x44   : > { %1494 = vmatpush1.bf16.msra.mxu0 %v4609_v61  ;;  %v4672_v61 = vld [vmem:[%s6691_s3 + $0x228] ss:$16 sps:$4 sm:$0xff]  }
  0x45   : > { %1495 = vmatprep.subr.bf16.mxu0 %v4617_v62  ;;  %1576 = vmatpush1.bf16.msra.mxu1 %v4612_v7  ;;  %v4677_v62 = vld [vmem:[%s6691_s3 + $0x244] ss:$16 sps:$4 sm:$0xff]  }
  0x46   : > { %1577 = vmatprep.subr.bf16.mxu1 %v4620_v8  ;;  %v4683_v7 = vld [vmem:[%s6691_s3 + $0x264] ss:$16 sps:$4 sm:$0xff]   ;;  %v4686_v8 = vld [vmem:[%s6691_s3 + $0x26c] ss:$16 sps:$4 sm:$0xff]  }
  0x48   : > { %1496 = vmatpush1.bf16.msra.mxu0 %v4615_v1 }
  0x49   : > { %1497 = vmatprep.subr.bf16.mxu0 %v4623_v2  ;;  %1578 = vmatpush1.bf16.msra.mxu1 %v4618_v11  ;;  %v4681_v11 = vld [vmem:[%s6691_s3 + $0x260] ss:$16 sps:$4 sm:$0xff]  }
  0x4a   : > { %1579 = vmatprep.subr.bf16.mxu1 %v4626_v12  ;;  %v4684_v12 = vld [vmem:[%s6691_s3 + $0x268] ss:$16 sps:$4 sm:$0xff]  }
  0x4c   : > { %1498 = vmatpush1.bf16.msra.mxu0 %v4621_v5  ;;  %v4678_v5 = vld [vmem:[%s6691_s3 + $0x248] ss:$16 sps:$4 sm:$0xff]  }
  0x4d   : > { %1499 = vmatprep.subr.bf16.mxu0 %v4629_v6  ;;  %1580 = vmatpush1.bf16.msra.mxu1 %v4624_v15  ;;  %v4687_v15 = vld [vmem:[%s6691_s3 + $0x280] ss:$16 sps:$4 sm:$0xff]  }
  0x4e   : > { %1581 = vmatprep.subr.bf16.mxu1 %v4632_v16  ;;  %v4690_v16 = vld [vmem:[%s6691_s3 + $0x288] ss:$16 sps:$4 sm:$0xff]  }
  0x50   : > { %1500 = vmatpush1.bf16.msra.mxu0 %v4627_v9 }
  0x51   : > { %1501 = vmatprep.subr.bf16.mxu0 %v4635_v10  ;;  %1582 = vmatpush1.bf16.msra.mxu1 %v4630_v19  ;;  %v4693_v19 = vld [vmem:[%s6691_s3 + $0x2a0] ss:$16 sps:$4 sm:$0xff]  }
  0x52   : > { %1583 = vmatprep.subr.bf16.mxu1 %v4638_v20  ;;  %v4696_v20 = vld [vmem:[%s6691_s3 + $0x2a8] ss:$16 sps:$4 sm:$0xff]  }
  0x54   : > { %1502 = vmatpush1.bf16.msra.mxu0 %v4633_v13  ;;  %v4689_v13 = vld [vmem:[%s6691_s3 + $0x284] ss:$16 sps:$4 sm:$0xff]  }
  0x55   : > { %1503 = vmatprep.subr.bf16.mxu0 %v4641_v14  ;;  %1584 = vmatpush1.bf16.msra.mxu1 %v4636_v22  ;;  %v4692_v14 = vld [vmem:[%s6691_s3 + $0x28c] ss:$16 sps:$4 sm:$0xff]  }
  0x56   : > { %1585 = vmatprep.subr.bf16.mxu1 %v4644_v23  ;;  %v4704_v22 = vld [vmem:[%s6691_s3 + $0x2cc] ss:$16 sps:$4 sm:$0xff]   ;;  %v4699_v23 = vld [vmem:[%s6691_s3 + $0x2c0] ss:$16 sps:$4 sm:$0xff]  }
  0x58   : > { %1504 = vmatpush1.bf16.msra.mxu0 %v4639_v17  ;;  %v4695_v17 = vld [vmem:[%s6691_s3 + $0x2a4] ss:$16 sps:$4 sm:$0xff]  }
  0x59   : > { %1505 = vmatprep.subr.bf16.mxu0 %v4647_v18  ;;  %1586 = vmatpush1.bf16.msra.mxu1 %v4642_v24  ;;  %v4698_v18 = vld [vmem:[%s6691_s3 + $0x2ac] ss:$16 sps:$4 sm:$0xff]   ;;  %v4702_v24 = vld [vmem:[%s6691_s3 + $0x2c8] ss:$16 sps:$4 sm:$0xff]  }
  0x5a   : > { %1587 = vmatprep.subr.bf16.mxu1 %v4650_v25  ;;  %v4707_v25 = vld [vmem:[%s6691_s3 + $0x2e4] ss:$16 sps:$4 sm:$0xff]  }
  0x5c   : > { %1506 = vmatpush1.bf16.msra.mxu0 %v4645_v21  ;;  %v4701_v21 = vld [vmem:[%s6691_s3 + $0x2c4] ss:$16 sps:$4 sm:$0xff]  }
  0x5d   : > { %1588 = vmatpush1.bf16.msra.mxu1 %v4648_v26  ;;  %1507 = vmatprep.subr.bf16.mxu0 %v4653_v27  ;;  %v4710_v26 = vld [vmem:[%s6691_s3 + $0x2ec] ss:$16 sps:$4 sm:$0xff]   ;;  %v4705_v27 = vld [vmem:[%s6691_s3 + $0x2e0] ss:$16 sps:$4 sm:$0xff]  }
  0x5e   : > { %1589 = vmatprep.subr.bf16.mxu1 %v4656_v28  ;;  %v4708_v28 = vld [vmem:[%s6691_s3 + $0x2e8] ss:$16 sps:$4 sm:$0xff]  }
  0x60   : > { %1508 = vmatpush1.bf16.msra.mxu0 %v4651_v29  ;;  %v4713_v29 = vld [vmem:[%s6691_s3 + $0x304] ss:$16 sps:$4 sm:$0xff]  }
  0x61   : > { %1590 = vmatpush1.bf16.msra.mxu1 %v4654_v30  ;;  %1509 = vmatprep.subr.bf16.mxu0 %v4659_v31  ;;  %v4716_v30 = vld [vmem:[%s6691_s3 + $0x30c] ss:$16 sps:$4 sm:$0xff]   ;;  %v4711_v31 = vld [vmem:[%s6691_s3 + $0x300] ss:$16 sps:$4 sm:$0xff]  }
  0x62   : > { %1591 = vmatprep.subr.bf16.mxu1 %v4662_v32  ;;  %v4714_v32 = vld [vmem:[%s6691_s3 + $0x308] ss:$16 sps:$4 sm:$0xff]  }
  0x64   : > { %1510 = vmatpush1.bf16.msra.mxu0 %v4657_v33  ;;  %v4719_v33 = vld [vmem:[%s6691_s3 + $0x324] ss:$16 sps:$4 sm:$0xff]  }
  0x65   : > { %1592 = vmatpush1.bf16.msra.mxu1 %v4660_v34  ;;  %1520 = vmatprep.subr.bf16.mxu0 %v4665_v35  ;;  %v4722_v34 = vld [vmem:[%s6691_s3 + $0x32c] ss:$16 sps:$4 sm:$0xff]   ;;  %v4717_v35 = vld [vmem:[%s6691_s3 + $0x320] ss:$16 sps:$4 sm:$0xff]  }
  0x66   : > { %1602 = vmatprep.subr.bf16.mxu1 %v4668_v36  ;;  %v4720_v36 = vld [vmem:[%s6691_s3 + $0x328] ss:$16 sps:$4 sm:$0xff]  }
  0xfa   : > { %v633_v44 = vpop.f32.mrb[0].mxu0 }
  0xfb   : > { %v634_v45 = vadd.f32 %v633_v44, %v422_v42  ;;  %v635_v46 = vpop.f32.mrb[1].mxu0  ;;  %v5604_v0 = vpop.f32.mrb[0].mxu1  ;;  %v4728_v42 = vld [vmem:[%s6691_s3 + $0x34c] ss:$16 sps:$4 sm:$0xff]   ;;  %v4726_v44 = vld [vmem:[%s6691_s3 + $0x348] ss:$16 sps:$4 sm:$0xff]  }
  0xfc   : > { %v636_v47 = vadd.f32 %v635_v46, %v426_v43  ;;  %v637_v48 = vpop.f32.mrb[2].mxu0  ;;  %v676_v1 = vpop.f32.mrb[1].mxu1  ;;  %v4723_v43 = vld [vmem:[%s6691_s3 + $0x340] ss:$16 sps:$4 sm:$0xff]   ;;  %v4734_v46 = vld [vmem:[%s6691_s3 + $0x36c] ss:$16 sps:$4 sm:$0xff]  }
  0xfd   : > { %v681_v49 = vmax.f32 %v634_v45, 0.0  ;;  %v638_v50 = vpop.f32.mrb[3].mxu0  ;;  %v677_v2 = vadd.f32 %v676_v1, %v434_v59  ;;  %v678_v3 = vpop.f32.mrb[2].mxu1  ;;  %v4731_v45 = vld [vmem:[%s6691_s3 + $0x364] ss:$16 sps:$4 sm:$0xff]  }
  0xfe   : > { %v682_v51 = vmax.f32 %v636_v47, 0.0  ;;  %v679_v6 = vpop.f32.mrb[3].mxu1  ;;  %v4729_v47 = vld [vmem:[%s6691_s3 + $0x360] ss:$16 sps:$4 sm:$0xff]   ;;  %v4732_v48 = vld [vmem:[%s6691_s3 + $0x368] ss:$16 sps:$4 sm:$0xff]  }
  0xff   : > { %v685_v56 = vpack.c.bf16 %v681_v49, %v681_v49  ;;  %v684_v9 = vmax.f32 %v677_v2, 0.0  ;;  %v4737_v49 = vld [vmem:[%s6691_s3 + $0x384] ss:$16 sps:$4 sm:$0xff]   ;;  %v4740_v50 = vld [vmem:[%s6691_s3 + $0x38c] ss:$16 sps:$4 sm:$0xff]  }
 0x100   : > { %v686_v53 = vpack.c.bf16 %v682_v51, %v682_v51  ;;  %v4735_v51 = vld [vmem:[%s6691_s3 + $0x380] ss:$16 sps:$4 sm:$0xff]   ;;  %v4749_v59 = vld [vmem:[%s6691_s3 + $0x3c4] ss:$16 sps:$4 sm:$0xff]   ;;  %v4758_v1 = vld [vmem:[%s6691_s3 + $0x3ec] ss:$16 sps:$4 sm:$0xff]  }
 0x101   : > { %v688_v10 = vpack.c.bf16 %v684_v9, %v684_v9  ;;  %v4753_v2 = vld [vmem:[%s6691_s3 + $0x3e0] ss:$16 sps:$4 sm:$0xff]   ;;  %v4767_v9 = vld [vmem:[%s6693_s5 + $0x24] ss:$16 sps:$4 sm:$0xff]  }
 0x102   : > { %1511 = vmatprep.mubr.bf16.mxu0 %v686_v53  ;;  %1593 = vmatprep.mubr.bf16.mxu1 %v686_v53  ;;  %v4738_v53 = vld [vmem:[%s6691_s3 + $0x388] ss:$16 sps:$4 sm:$0xff]   ;;  %v4759_v6 = vld [vmem:[%s6693_s5] ss:$16 sps:$4 sm:$0xff]  }
 0x103   : > { %1512 = vmatmul.mubr.bf16.vlgmr.msra.gmra.mrb[4].mxu0 %v685_v56  ;;  %1594 = vmatmul.mubr.bf16.vlgmr.msra.gmra.mrb[4].mxu1 %v685_v56  ;;  %v4746_v56 = vld [vmem:[%s6691_s3 + $0x3ac] ss:$16 sps:$4 sm:$0xff]  }
 0x104   : > { %1521 = vmatpush1.bf16.msra.mxu0 %v4663_v54  ;;  %1603 = vmatpush1.bf16.msra.mxu1 %v4666_v55  ;;  %v5733_v54 = vsub.s32 2, %v5558_v38  ;;  %v4743_v55 = vld [vmem:[%s6691_s3 + $0x3a4] ss:$16 sps:$4 sm:$0xff]  }
 0x105   : > { %1522 = vmatprep.subr.bf16.mxu0 %v4671_v57  ;;  %1604 = vmatprep.subr.bf16.mxu1 %v4674_v58  ;;  %v4741_v57 = vld [vmem:[%s6691_s3 + $0x3a0] ss:$16 sps:$4 sm:$0xff]   ;;  %v4744_v58 = vld [vmem:[%s6691_s3 + $0x3a8] ss:$16 sps:$4 sm:$0xff]  }
 0x106   : > { %1552 = vmatprep.mubr.bf16.mxu0 %v688_v10  ;;  %1634 = vmatprep.mubr.bf16.mxu1 %v688_v10  ;;  %v430_v38 = vrot.slane %v5566_v40, %v5733_v54  ;;  %v4750_v40 = vld [vmem:[%s6691_s3 + $0x3c8] ss:$16 sps:$4 sm:$0xff]   ;;  %v4770_v10 = vld [vmem:[%s6693_s5 + $0x2c] ss:$16 sps:$4 sm:$0xff]  }
 0x108   : > { %1523 = vmatpush1.bf16.msra.mxu0 %v4669_v60  ;;  %1605 = vmatpush1.bf16.msra.mxu1 %v4672_v61  ;;  %v4752_v60 = vld [vmem:[%s6691_s3 + $0x3cc] ss:$16 sps:$4 sm:$0xff]   ;;  %v4747_v61 = vld [vmem:[%s6691_s3 + $0x3c0] ss:$16 sps:$4 sm:$0xff]  }
 0x109   : > { %1524 = vmatprep.subr.bf16.mxu0 %v4677_v62  ;;  %1606 = vmatprep.subr.bf16.mxu1 %v4680_v63  ;;  %v675_v62 = vadd.f32 %v5604_v0, %v430_v38  ;;  %v4755_v63 = vld [vmem:[%s6691_s3 + $0x3e4] ss:$16 sps:$4 sm:$0xff]   ;;  %v4756_v0 = vld [vmem:[%s6691_s3 + $0x3e8] ss:$16 sps:$4 sm:$0xff]  }
 0x10a   : > { %v4833_v38 = vld [vmem:[%s6693_s5 + $0x184] ss:$16 sps:$4 sm:$0xff]  }
 0x10b   : > { %v683_v3 = vmax.f32 %v675_v62, 0.0  ;;  %v4842_v62 = vld [vmem:[%s6693_s5 + $0x1ac] ss:$16 sps:$4 sm:$0xff]  }
 0x10c   : > { %1525 = vmatpush1.bf16.msra.mxu0 %v4675_v4  ;;  %1607 = vmatpush1.bf16.msra.mxu1 %v4678_v5  ;;  %v4761_v4 = vld [vmem:[%s6693_s5 + $0x4] ss:$16 sps:$4 sm:$0xff]   ;;  %v4764_v5 = vld [vmem:[%s6693_s5 + $0xc] ss:$16 sps:$4 sm:$0xff]  }
 0x10d   : > { %1526 = vmatprep.subr.bf16.mxu0 %v4683_v7  ;;  %1608 = vmatprep.subr.bf16.mxu1 %v4686_v8  ;;  %v4762_v7 = vld [vmem:[%s6693_s5 + $0x8] ss:$16 sps:$4 sm:$0xff]   ;;  %v687_v8 = vpack.c.bf16 %v683_v3, %v683_v3  ;;  %v4843_v3 = vld [vmem:[%s6693_s5 + $0x1c0] ss:$16 sps:$4 sm:$0xff]  }
 0x110   : > { %1527 = vmatpush1.bf16.msra.mxu0 %v4681_v11  ;;  %1609 = vmatpush1.bf16.msra.mxu1 %v4684_v12  ;;  %v4765_v11 = vld [vmem:[%s6693_s5 + $0x20] ss:$16 sps:$4 sm:$0xff]   ;;  %v4768_v12 = vld [vmem:[%s6693_s5 + $0x28] ss:$16 sps:$4 sm:$0xff]  }
 0x111   : > { %1528 = vmatprep.subr.bf16.mxu0 %v4689_v13  ;;  %1610 = vmatprep.subr.bf16.mxu1 %v4692_v14  ;;  %v4773_v13 = vld [vmem:[%s6693_s5 + $0x44] ss:$16 sps:$4 sm:$0xff]   ;;  %v4776_v14 = vld [vmem:[%s6693_s5 + $0x4c] ss:$16 sps:$4 sm:$0xff]  }
 0x114   : > { %1529 = vmatpush1.bf16.msra.mxu0 %v4687_v15  ;;  %1611 = vmatpush1.bf16.msra.mxu1 %v4690_v16  ;;  %v4771_v15 = vld [vmem:[%s6693_s5 + $0x40] ss:$16 sps:$4 sm:$0xff]   ;;  %v4774_v16 = vld [vmem:[%s6693_s5 + $0x48] ss:$16 sps:$4 sm:$0xff]  }
 0x115   : > { %1530 = vmatprep.subr.bf16.mxu0 %v4695_v17  ;;  %1612 = vmatprep.subr.bf16.mxu1 %v4698_v18  ;;  %v4779_v17 = vld [vmem:[%s6693_s5 + $0x64] ss:$16 sps:$4 sm:$0xff]   ;;  %v4782_v18 = vld [vmem:[%s6693_s5 + $0x6c] ss:$16 sps:$4 sm:$0xff]  }
 0x118   : > { %1531 = vmatpush1.bf16.msra.mxu0 %v4693_v19  ;;  %1613 = vmatpush1.bf16.msra.mxu1 %v4696_v20  ;;  %v4777_v19 = vld [vmem:[%s6693_s5 + $0x60] ss:$16 sps:$4 sm:$0xff]   ;;  %v4780_v20 = vld [vmem:[%s6693_s5 + $0x68] ss:$16 sps:$4 sm:$0xff]  }
 0x119   : > { %1532 = vmatprep.subr.bf16.mxu0 %v4701_v21  ;;  %1614 = vmatprep.subr.bf16.mxu1 %v4704_v22  ;;  %v4785_v21 = vld [vmem:[%s6693_s5 + $0x84] ss:$16 sps:$4 sm:$0xff]   ;;  %v4788_v22 = vld [vmem:[%s6693_s5 + $0x8c] ss:$16 sps:$4 sm:$0xff]  }
 0x11c   : > { %1533 = vmatpush1.bf16.msra.mxu0 %v4699_v23  ;;  %1615 = vmatpush1.bf16.msra.mxu1 %v4702_v24  ;;  %v4783_v23 = vld [vmem:[%s6693_s5 + $0x80] ss:$16 sps:$4 sm:$0xff]   ;;  %v4786_v24 = vld [vmem:[%s6693_s5 + $0x88] ss:$16 sps:$4 sm:$0xff]  }
 0x11d   : > { %1534 = vmatprep.subr.bf16.mxu0 %v4707_v25  ;;  %1616 = vmatprep.subr.bf16.mxu1 %v4710_v26  ;;  %v4791_v25 = vld [vmem:[%s6693_s5 + $0xa4] ss:$16 sps:$4 sm:$0xff]   ;;  %v4794_v26 = vld [vmem:[%s6693_s5 + $0xac] ss:$16 sps:$4 sm:$0xff]  }
 0x120   : > { %1535 = vmatpush1.bf16.msra.mxu0 %v4705_v27  ;;  %1617 = vmatpush1.bf16.msra.mxu1 %v4708_v28  ;;  %v4789_v27 = vld [vmem:[%s6693_s5 + $0xa0] ss:$16 sps:$4 sm:$0xff]   ;;  %v4792_v28 = vld [vmem:[%s6693_s5 + $0xa8] ss:$16 sps:$4 sm:$0xff]  }
 0x121   : > { %1536 = vmatprep.subr.bf16.mxu0 %v4713_v29  ;;  %1618 = vmatprep.subr.bf16.mxu1 %v4716_v30  ;;  %v4797_v29 = vld [vmem:[%s6693_s5 + $0xc4] ss:$16 sps:$4 sm:$0xff]   ;;  %v4800_v30 = vld [vmem:[%s6693_s5 + $0xcc] ss:$16 sps:$4 sm:$0xff]  }
 0x124   : > { %1537 = vmatpush1.bf16.msra.mxu0 %v4711_v31  ;;  %1619 = vmatpush1.bf16.msra.mxu1 %v4714_v32  ;;  %v4795_v31 = vld [vmem:[%s6693_s5 + $0xc0] ss:$16 sps:$4 sm:$0xff]   ;;  %v4798_v32 = vld [vmem:[%s6693_s5 + $0xc8] ss:$16 sps:$4 sm:$0xff]  }
 0x125   : > { %1538 = vmatprep.subr.bf16.mxu0 %v4719_v33  ;;  %1620 = vmatprep.subr.bf16.mxu1 %v4722_v34  ;;  %v4803_v33 = vld [vmem:[%s6693_s5 + $0xe4] ss:$16 sps:$4 sm:$0xff]   ;;  %v4806_v34 = vld [vmem:[%s6693_s5 + $0xec] ss:$16 sps:$4 sm:$0xff]  }
 0x128   : > { %1539 = vmatpush1.bf16.msra.mxu0 %v4717_v35  ;;  %1621 = vmatpush1.bf16.msra.mxu1 %v4720_v36  ;;  %v4801_v35 = vld [vmem:[%s6693_s5 + $0xe0] ss:$16 sps:$4 sm:$0xff]   ;;  %v4804_v36 = vld [vmem:[%s6693_s5 + $0xe8] ss:$16 sps:$4 sm:$0xff]  }
 0x129   : > { %1540 = vmatprep.subr.bf16.mxu0 %v4725_v37  ;;  %1622 = vmatprep.subr.bf16.mxu1 %v4728_v42  ;;  %v4809_v37 = vld [vmem:[%s6693_s5 + $0x104] ss:$16 sps:$4 sm:$0xff]   ;;  %v4812_v42 = vld [vmem:[%s6693_s5 + $0x10c] ss:$16 sps:$4 sm:$0xff]  }
 0x12c   : > { %1541 = vmatpush1.bf16.msra.mxu0 %v4723_v43  ;;  %1623 = vmatpush1.bf16.msra.mxu1 %v4726_v44  ;;  %v4807_v43 = vld [vmem:[%s6693_s5 + $0x100] ss:$16 sps:$4 sm:$0xff]   ;;  %v4810_v44 = vld [vmem:[%s6693_s5 + $0x108] ss:$16 sps:$4 sm:$0xff]  }
 0x12d   : > { %1542 = vmatprep.subr.bf16.mxu0 %v4731_v45  ;;  %1624 = vmatprep.subr.bf16.mxu1 %v4734_v46  ;;  %v4815_v45 = vld [vmem:[%s6693_s5 + $0x124] ss:$16 sps:$4 sm:$0xff]   ;;  %v4818_v46 = vld [vmem:[%s6693_s5 + $0x12c] ss:$16 sps:$4 sm:$0xff]  }
 0x130   : > { %1543 = vmatpush1.bf16.msra.mxu0 %v4729_v47  ;;  %1625 = vmatpush1.bf16.msra.mxu1 %v4732_v48  ;;  %v4813_v47 = vld [vmem:[%s6693_s5 + $0x120] ss:$16 sps:$4 sm:$0xff]   ;;  %v4816_v48 = vld [vmem:[%s6693_s5 + $0x128] ss:$16 sps:$4 sm:$0xff]  }
 0x131   : > { %1544 = vmatprep.subr.bf16.mxu0 %v4737_v49  ;;  %1626 = vmatprep.subr.bf16.mxu1 %v4740_v50  ;;  %v4821_v49 = vld [vmem:[%s6693_s5 + $0x144] ss:$16 sps:$4 sm:$0xff]   ;;  %v4824_v50 = vld [vmem:[%s6693_s5 + $0x14c] ss:$16 sps:$4 sm:$0xff]  }
 0x134   : > { %1545 = vmatpush1.bf16.msra.mxu0 %v4735_v51  ;;  %1627 = vmatpush1.bf16.msra.mxu1 %v4738_v53  ;;  %v4819_v51 = vld [vmem:[%s6693_s5 + $0x140] ss:$16 sps:$4 sm:$0xff]   ;;  %v4822_v53 = vld [vmem:[%s6693_s5 + $0x148] ss:$16 sps:$4 sm:$0xff]  }
 0x135   : > { %1546 = vmatprep.subr.bf16.mxu0 %v4743_v55  ;;  %1628 = vmatprep.subr.bf16.mxu1 %v4746_v56  ;;  %v4827_v55 = vld [vmem:[%s6693_s5 + $0x164] ss:$16 sps:$4 sm:$0xff]   ;;  %v4830_v56 = vld [vmem:[%s6693_s5 + $0x16c] ss:$16 sps:$4 sm:$0xff]  }
 0x138   : > { %1547 = vmatpush1.bf16.msra.mxu0 %v4741_v57  ;;  %1629 = vmatpush1.bf16.msra.mxu1 %v4744_v58  ;;  %v4825_v57 = vld [vmem:[%s6693_s5 + $0x160] ss:$16 sps:$4 sm:$0xff]   ;;  %v4828_v58 = vld [vmem:[%s6693_s5 + $0x168] ss:$16 sps:$4 sm:$0xff]  }
 0x139   : > { %1548 = vmatprep.subr.bf16.mxu0 %v4749_v59  ;;  %1630 = vmatprep.subr.bf16.mxu1 %v4752_v60  ;;  %v4836_v59 = vld [vmem:[%s6693_s5 + $0x18c] ss:$16 sps:$4 sm:$0xff]   ;;  %v4831_v60 = vld [vmem:[%s6693_s5 + $0x180] ss:$16 sps:$4 sm:$0xff]  }
 0x13c   : > { %1549 = vmatpush1.bf16.msra.mxu0 %v4747_v61  ;;  %1631 = vmatpush1.bf16.msra.mxu1 %v4750_v40  ;;  %v4834_v61 = vld [vmem:[%s6693_s5 + $0x188] ss:$16 sps:$4 sm:$0xff]   ;;  %v4839_v40 = vld [vmem:[%s6693_s5 + $0x1a4] ss:$16 sps:$4 sm:$0xff]  }
 0x13d   : > { %1550 = vmatprep.subr.bf16.mxu0 %v4755_v63  ;;  %1632 = vmatprep.subr.bf16.mxu1 %v4758_v1  ;;  %v4837_v63 = vld [vmem:[%s6693_s5 + $0x1a0] ss:$16 sps:$4 sm:$0xff]   ;;  %v4840_v1 = vld [vmem:[%s6693_s5 + $0x1a8] ss:$16 sps:$4 sm:$0xff]  }
 0x140   : > { %1551 = vmatpush1.bf16.msra.mxu0 %v4753_v2  ;;  %1633 = vmatpush1.bf16.msra.mxu1 %v4756_v0  ;;  %v4845_v2 = vld [vmem:[%s6693_s5 + $0x1c4] ss:$16 sps:$4 sm:$0xff]   ;;  %v4848_v0 = vld [vmem:[%s6693_s5 + $0x1cc] ss:$16 sps:$4 sm:$0xff]  }
 0x141   : > { %2441 = vmatprep.subr.bf16.mxu0 %v4761_v4  ;;  %2523 = vmatprep.subr.bf16.mxu1 %v4764_v5  ;;  %v4846_v4 = vld [vmem:[%s6693_s5 + $0x1c8] ss:$16 sps:$4 sm:$0xff]   ;;  %v4851_v5 = vld [vmem:[%s6693_s5 + $0x1e4] ss:$16 sps:$4 sm:$0xff]  }
 0x143   : > { %1553 = vmatmul.mubr.bf16.vlgmr.msra.gmra.mrb[4].mxu0 %v687_v8  ;;  %1635 = vmatmul.mubr.bf16.vlgmr.msra.gmra.mrb[4].mxu1 %v687_v8  ;;  %v4852_v8 = vld [vmem:[%s6693_s5 + $0x1e8] ss:$16 sps:$4 sm:$0xff]  }
 0x144   : > { %2442 = vmatpush1.bf16.msra.mxu0 %v4759_v6  ;;  %2524 = vmatpush1.bf16.msra.mxu1 %v4762_v7  ;;  %v4854_v6 = vld [vmem:[%s6693_s5 + $0x1ec] ss:$16 sps:$4 sm:$0xff]   ;;  %v4849_v7 = vld [vmem:[%s6693_s5 + $0x1e0] ss:$16 sps:$4 sm:$0xff]  }
 0x145   : > { %2443 = vmatprep.subr.bf16.mxu0 %v4767_v9  ;;  %2525 = vmatprep.subr.bf16.mxu1 %v4770_v10  ;;  %v4857_v9 = vld [vmem:[%s6693_s5 + $0x204] ss:$16 sps:$4 sm:$0xff]   ;;  %v4860_v10 = vld [vmem:[%s6693_s5 + $0x20c] ss:$16 sps:$4 sm:$0xff]  }
 0x148   : > { %2444 = vmatpush1.bf16.msra.mxu0 %v4765_v11  ;;  %2526 = vmatpush1.bf16.msra.mxu1 %v4768_v12  ;;  %v5975_v11 = vld [vmem:[%s6692_s4] sm:$0xf] }
 0x149   : > { %2445 = vmatprep.subr.bf16.mxu0 %v4773_v13  ;;  %2527 = vmatprep.subr.bf16.mxu1 %v4776_v14  ;;  %v822_v12 = vrot.slane %v5975_v11, %v5561_v39  ;;  %v826_v13 = vrot.slane %v5975_v11, %v5569_v41  ;;  %v834_v14 = vrot.slane %v5975_v11, %v5576_v52 }
 0x14c   : > { %2446 = vmatpush1.bf16.msra.mxu0 %v4771_v15  ;;  %2528 = vmatpush1.bf16.msra.mxu1 %v4774_v16 }
 0x14d   : > { %2447 = vmatprep.subr.bf16.mxu0 %v4779_v17  ;;  %2529 = vmatprep.subr.bf16.mxu1 %v4782_v18 }
 0x150   : > { %2448 = vmatpush1.bf16.msra.mxu0 %v4777_v19  ;;  %2530 = vmatpush1.bf16.msra.mxu1 %v4780_v20 }
 0x151   : > { %2449 = vmatprep.subr.bf16.mxu0 %v4785_v21  ;;  %2531 = vmatprep.subr.bf16.mxu1 %v4788_v22 }
 0x154   : > { %2450 = vmatpush1.bf16.msra.mxu0 %v4783_v23  ;;  %2532 = vmatpush1.bf16.msra.mxu1 %v4786_v24 }
 0x155   : > { %2451 = vmatprep.subr.bf16.mxu0 %v4791_v25  ;;  %2533 = vmatprep.subr.bf16.mxu1 %v4794_v26 }
 0x158   : > { %2452 = vmatpush1.bf16.msra.mxu0 %v4789_v27  ;;  %2534 = vmatpush1.bf16.msra.mxu1 %v4792_v28 }
 0x159   : > { %2453 = vmatprep.subr.bf16.mxu0 %v4797_v29  ;;  %2535 = vmatprep.subr.bf16.mxu1 %v4800_v30  ;;  %v4855_v30 = vld [vmem:[%s6693_s5 + $0x200] ss:$16 sps:$4 sm:$0xff]  }
 0x15c   : > { %2454 = vmatpush1.bf16.msra.mxu0 %v4795_v31  ;;  %2536 = vmatpush1.bf16.msra.mxu1 %v4798_v32  ;;  %v4858_v31 = vld [vmem:[%s6693_s5 + $0x208] ss:$16 sps:$4 sm:$0xff]  }
 0x15d   : > { %2455 = vmatprep.subr.bf16.mxu0 %v4803_v33  ;;  %2537 = vmatprep.subr.bf16.mxu1 %v4806_v34  ;;  %v4863_v33 = vld [vmem:[%s6693_s5 + $0x224] ss:$16 sps:$4 sm:$0xff]   ;;  %v4866_v34 = vld [vmem:[%s6693_s5 + $0x22c] ss:$16 sps:$4 sm:$0xff]  }
 0x160   : > { %2456 = vmatpush1.bf16.msra.mxu0 %v4801_v35  ;;  %2538 = vmatpush1.bf16.msra.mxu1 %v4804_v36  ;;  %v4861_v36 = vld [vmem:[%s6693_s5 + $0x220] ss:$16 sps:$4 sm:$0xff]  }
 0x161   : > { %2457 = vmatprep.subr.bf16.mxu0 %v4809_v37  ;;  %2539 = vmatprep.subr.bf16.mxu1 %v4812_v42  ;;  %v4864_v37 = vld [vmem:[%s6693_s5 + $0x228] ss:$16 sps:$4 sm:$0xff]   ;;  %v4869_v42 = vld [vmem:[%s6693_s5 + $0x244] ss:$16 sps:$4 sm:$0xff]  }
 0x164   : > { %2458 = vmatpush1.bf16.msra.mxu0 %v4807_v43  ;;  %2540 = vmatpush1.bf16.msra.mxu1 %v4810_v44  ;;  %v4872_v43 = vld [vmem:[%s6693_s5 + $0x24c] ss:$16 sps:$4 sm:$0xff]   ;;  %v4867_v44 = vld [vmem:[%s6693_s5 + $0x240] ss:$16 sps:$4 sm:$0xff]  }
 0x165   : > { %2459 = vmatprep.subr.bf16.mxu0 %v4815_v45  ;;  %2541 = vmatprep.subr.bf16.mxu1 %v4818_v46  ;;  %v4870_v45 = vld [vmem:[%s6693_s5 + $0x248] ss:$16 sps:$4 sm:$0xff]   ;;  %v4875_v46 = vld [vmem:[%s6693_s5 + $0x264] ss:$16 sps:$4 sm:$0xff]  }
 0x168   : > { %2460 = vmatpush1.bf16.msra.mxu0 %v4813_v47  ;;  %2542 = vmatpush1.bf16.msra.mxu1 %v4816_v48  ;;  %v4878_v47 = vld [vmem:[%s6693_s5 + $0x26c] ss:$16 sps:$4 sm:$0xff]   ;;  %v4873_v48 = vld [vmem:[%s6693_s5 + $0x260] ss:$16 sps:$4 sm:$0xff]  }
 0x169   : > { %2461 = vmatprep.subr.bf16.mxu0 %v4821_v49  ;;  %2543 = vmatprep.subr.bf16.mxu1 %v4824_v50  ;;  %v4876_v49 = vld [vmem:[%s6693_s5 + $0x268] ss:$16 sps:$4 sm:$0xff]   ;;  %v4881_v50 = vld [vmem:[%s6693_s5 + $0x284] ss:$16 sps:$4 sm:$0xff]  }
 0x16c   : > { %2462 = vmatpush1.bf16.msra.mxu0 %v4819_v51  ;;  %2544 = vmatpush1.bf16.msra.mxu1 %v4822_v53  ;;  %v4884_v51 = vld [vmem:[%s6693_s5 + $0x28c] ss:$16 sps:$4 sm:$0xff]   ;;  %v4879_v53 = vld [vmem:[%s6693_s5 + $0x280] ss:$16 sps:$4 sm:$0xff]  }
 0x16d   : > { %2463 = vmatprep.subr.bf16.mxu0 %v4827_v55  ;;  %2545 = vmatprep.subr.bf16.mxu1 %v4830_v56  ;;  %v4882_v55 = vld [vmem:[%s6693_s5 + $0x288] ss:$16 sps:$4 sm:$0xff]   ;;  %v4887_v56 = vld [vmem:[%s6693_s5 + $0x2a4] ss:$16 sps:$4 sm:$0xff]  }
 0x170   : > { %2464 = vmatpush1.bf16.msra.mxu0 %v4825_v57  ;;  %2546 = vmatpush1.bf16.msra.mxu1 %v4828_v58  ;;  %v4890_v57 = vld [vmem:[%s6693_s5 + $0x2ac] ss:$16 sps:$4 sm:$0xff]   ;;  %v4885_v58 = vld [vmem:[%s6693_s5 + $0x2a0] ss:$16 sps:$4 sm:$0xff]  }
 0x171   : > { %2465 = vmatprep.subr.bf16.mxu0 %v4833_v38  ;;  %2547 = vmatprep.subr.bf16.mxu1 %v4836_v59  ;;  %v4888_v38 = vld [vmem:[%s6693_s5 + $0x2a8] ss:$16 sps:$4 sm:$0xff]   ;;  %v4893_v59 = vld [vmem:[%s6693_s5 + $0x2c4] ss:$16 sps:$4 sm:$0xff]  }
 0x174   : > { %2466 = vmatpush1.bf16.msra.mxu0 %v4831_v60  ;;  %2548 = vmatpush1.bf16.msra.mxu1 %v4834_v61  ;;  %v4896_v60 = vld [vmem:[%s6693_s5 + $0x2cc] ss:$16 sps:$4 sm:$0xff]   ;;  %v4891_v61 = vld [vmem:[%s6693_s5 + $0x2c0] ss:$16 sps:$4 sm:$0xff]  }
 0x175   : > { %2467 = vmatprep.subr.bf16.mxu0 %v4839_v40  ;;  %2549 = vmatprep.subr.bf16.mxu1 %v4842_v62  ;;  %v4894_v40 = vld [vmem:[%s6693_s5 + $0x2c8] ss:$16 sps:$4 sm:$0xff]   ;;  %v4899_v62 = vld [vmem:[%s6693_s5 + $0x2e4] ss:$16 sps:$4 sm:$0xff]  }
 0x178   : > { %2468 = vmatpush1.bf16.msra.mxu0 %v4837_v63  ;;  %2550 = vmatpush1.bf16.msra.mxu1 %v4840_v1  ;;  %v4902_v63 = vld [vmem:[%s6693_s5 + $0x2ec] ss:$16 sps:$4 sm:$0xff]   ;;  %v4897_v1 = vld [vmem:[%s6693_s5 + $0x2e0] ss:$16 sps:$4 sm:$0xff]  }
 0x179   : > { %2469 = vmatprep.subr.bf16.mxu0 %v4845_v2  ;;  %2551 = vmatprep.subr.bf16.mxu1 %v4848_v0  ;;  %v4900_v2 = vld [vmem:[%s6693_s5 + $0x2e8] ss:$16 sps:$4 sm:$0xff]   ;;  %v4905_v0 = vld [vmem:[%s6693_s5 + $0x304] ss:$16 sps:$4 sm:$0xff]  }
 0x17c   : > { %2470 = vmatpush1.bf16.msra.mxu0 %v4843_v3  ;;  %2552 = vmatpush1.bf16.msra.mxu1 %v4846_v4  ;;  %v4908_v3 = vld [vmem:[%s6693_s5 + $0x30c] ss:$16 sps:$4 sm:$0xff]   ;;  %v4903_v4 = vld [vmem:[%s6693_s5 + $0x300] ss:$16 sps:$4 sm:$0xff]  }
 0x17d   : > { %2471 = vmatprep.subr.bf16.mxu0 %v4851_v5  ;;  %2553 = vmatprep.subr.bf16.mxu1 %v4854_v6  ;;  %v4906_v5 = vld [vmem:[%s6693_s5 + $0x308] ss:$16 sps:$4 sm:$0xff]   ;;  %v4911_v6 = vld [vmem:[%s6693_s5 + $0x324] ss:$16 sps:$4 sm:$0xff]  }
 0x180   : > { %2472 = vmatpush1.bf16.msra.mxu0 %v4849_v7  ;;  %2554 = vmatpush1.bf16.msra.mxu1 %v4852_v8  ;;  %v4914_v7 = vld [vmem:[%s6693_s5 + $0x32c] ss:$16 sps:$4 sm:$0xff]   ;;  %v4909_v8 = vld [vmem:[%s6693_s5 + $0x320] ss:$16 sps:$4 sm:$0xff]  }
 0x181   : > { %2482 = vmatprep.subr.bf16.mxu0 %v4857_v9  ;;  %2564 = vmatprep.subr.bf16.mxu1 %v4860_v10  ;;  %v4912_v9 = vld [vmem:[%s6693_s5 + $0x328] ss:$16 sps:$4 sm:$0xff]   ;;  %v4917_v10 = vld [vmem:[%s6693_s5 + $0x344] ss:$16 sps:$4 sm:$0xff]  }
 0x216   : > { %v1554_v15 = vpop.f32.mrb[4].mxu0  ;;  %v5983_v16 = vpop.f32.mrb[4].mxu1 }
 0x217   : > { %v4474_v17 = vadd.f32 %v1554_v15, %v822_v12  ;;  %v1556_v18 = vpop.f32.mrb[5].mxu0  ;;  %v1638_v19 = vpop.f32.mrb[5].mxu1  ;;  %v4920_v12 = vld [vmem:[%s6693_s5 + $0x34c] ss:$16 sps:$4 sm:$0xff]   ;;  %v4923_v15 = vld [vmem:[%s6693_s5 + $0x364] ss:$16 sps:$4 sm:$0xff]  }
 0x218   : > { %v4475_v20 = vadd.f32 %v1556_v18, %v826_v13  ;;  %v4477_v21 = vadd.f32 %v1638_v19, %v834_v14  ;;  %v1558_v22 = vpop.f32.mrb[6].mxu0  ;;  %v1640_v23 = vpop.f32.mrb[6].mxu1  ;;  %v4915_v13 = vld [vmem:[%s6693_s5 + $0x340] ss:$16 sps:$4 sm:$0xff]   ;;  %v4918_v14 = vld [vmem:[%s6693_s5 + $0x348] ss:$16 sps:$4 sm:$0xff]  }
 0x219   : > { %v1643_v24 = vmax.f32 %v4474_v17, 0.0  ;;  %v1559_v25 = vpop.f32.mrb[7].mxu0  ;;  %v1641_v26 = vpop.f32.mrb[7].mxu1  ;;  %v4926_v17 = vld [vmem:[%s6693_s5 + $0x36c] ss:$16 sps:$4 sm:$0xff]  }
 0x21a   : > { %v1644_v27 = vmax.f32 %v4475_v20, 0.0  ;;  %v1646_v28 = vmax.f32 %v4477_v21, 0.0  ;;  %v4921_v18 = vld [vmem:[%s6693_s5 + $0x360] ss:$16 sps:$4 sm:$0xff]   ;;  %v4924_v19 = vld [vmem:[%s6693_s5 + $0x368] ss:$16 sps:$4 sm:$0xff]  }
 0x21b   : > { %v1647_v32 = vpack.c.bf16 %v1643_v24, %v1643_v24  ;;  %v4929_v20 = vld [vmem:[%s6693_s5 + $0x384] ss:$16 sps:$4 sm:$0xff]   ;;  %v4932_v21 = vld [vmem:[%s6693_s5 + $0x38c] ss:$16 sps:$4 sm:$0xff]   ;;  %v4927_v22 = vld [vmem:[%s6693_s5 + $0x380] ss:$16 sps:$4 sm:$0xff]  }
 0x21c   : > { %v1648_v29 = vpack.c.bf16 %v1644_v27, %v1644_v27  ;;  %v1650_v35 = vpack.c.bf16 %v1646_v28, %v1646_v28  ;;  %v4930_v23 = vld [vmem:[%s6693_s5 + $0x388] ss:$16 sps:$4 sm:$0xff]   ;;  %v4935_v24 = vld [vmem:[%s6693_s5 + $0x3a4] ss:$16 sps:$4 sm:$0xff]   ;;  %v4938_v25 = vld [vmem:[%s6693_s5 + $0x3ac] ss:$16 sps:$4 sm:$0xff]   ;;  %v830_v28 = vrot.slane %v5975_v11, %v5733_v54 }
 0x21d   : > { %v4933_v26 = vld [vmem:[%s6693_s5 + $0x3a0] ss:$16 sps:$4 sm:$0xff]   ;;  %v4936_v27 = vld [vmem:[%s6693_s5 + $0x3a8] ss:$16 sps:$4 sm:$0xff]  }
 0x21e   : > { %2473 = vmatprep.mubr.bf16.mxu0 %v1648_v29  ;;  %2555 = vmatprep.mubr.bf16.mxu1 %v1648_v29  ;;  %v4941_v29 = vld [vmem:[%s6693_s5 + $0x3c4] ss:$16 sps:$4 sm:$0xff]   ;;  %v4942_v11 = vld [vmem:[%s6693_s5 + $0x3c8] ss:$16 sps:$4 sm:$0xff]  }
 0x21f   : > { %2474 = vmatmul.mubr.bf16.vlgmr.msra.gmra.mrb[8].mxu0 %v1647_v32  ;;  %2556 = vmatmul.mubr.bf16.vlgmr.msra.gmra.mrb[8].mxu1 %v1647_v32  ;;  %v4476_v32 = vadd.f32 %v5983_v16, %v830_v28  ;;  %v4948_v16 = vld [vmem:[%s6693_s5 + $0x3e8] ss:$16 sps:$4 sm:$0xff]   ;;  %v5025_v28 = vld [vmem:[%s6695_s7 + $0x184] ss:$16 sps:$4 sm:$0xff]  }
 0x220   : > { %2483 = vmatpush1.bf16.msra.mxu0 %v4855_v30  ;;  %2565 = vmatpush1.bf16.msra.mxu1 %v4858_v31  ;;  %v4944_v30 = vld [vmem:[%s6693_s5 + $0x3cc] ss:$16 sps:$4 sm:$0xff]   ;;  %v4939_v31 = vld [vmem:[%s6693_s5 + $0x3c0] ss:$16 sps:$4 sm:$0xff]  }
 0x221   : > { %2514 = vmatprep.mubr.bf16.mxu0 %v1650_v35  ;;  %2596 = vmatprep.mubr.bf16.mxu1 %v1650_v35  ;;  %v4945_v35 = vld [vmem:[%s6693_s5 + $0x3e0] ss:$16 sps:$4 sm:$0xff]  }
 0x222   : > { %2484 = vmatprep.subr.bf16.mxu0 %v4863_v33  ;;  %2566 = vmatprep.subr.bf16.mxu1 %v4866_v34  ;;  %v4947_v33 = vld [vmem:[%s6693_s5 + $0x3e4] ss:$16 sps:$4 sm:$0xff]   ;;  %v4950_v34 = vld [vmem:[%s6693_s5 + $0x3ec] ss:$16 sps:$4 sm:$0xff]  }
 0x224   : > { %2485 = vmatpush1.bf16.msra.mxu0 %v4861_v36  ;;  %2567 = vmatpush1.bf16.msra.mxu1 %v4864_v37  ;;  %v1645_v36 = vmax.f32 %v4476_v32, 0.0  ;;  %v4953_v37 = vld [vmem:[%s6695_s7 + $0x4] ss:$16 sps:$4 sm:$0xff]   ;;  %v5034_v32 = vld [vmem:[%s6695_s7 + $0x1ac] ss:$16 sps:$4 sm:$0xff]  }
 0x225   : > { %2486 = vmatprep.subr.bf16.mxu0 %v4869_v42  ;;  %2568 = vmatprep.subr.bf16.mxu1 %v4872_v43  ;;  %v4956_v42 = vld [vmem:[%s6695_s7 + $0xc] ss:$16 sps:$4 sm:$0xff]   ;;  %v4951_v43 = vld [vmem:[%s6695_s7] ss:$16 sps:$4 sm:$0xff]  }
 0x228   : > { %2487 = vmatpush1.bf16.msra.mxu0 %v4867_v44  ;;  %2569 = vmatpush1.bf16.msra.mxu1 %v4870_v45  ;;  %v4954_v44 = vld [vmem:[%s6695_s7 + $0x8] ss:$16 sps:$4 sm:$0xff]   ;;  %v1649_v45 = vpack.c.bf16 %v1645_v36, %v1645_v36  ;;  %v5035_v36 = vld [vmem:[%s6695_s7 + $0x1c0] ss:$16 sps:$4 sm:$0xff]  }
 0x229   : > { %2488 = vmatprep.subr.bf16.mxu0 %v4875_v46  ;;  %2570 = vmatprep.subr.bf16.mxu1 %v4878_v47  ;;  %v4959_v46 = vld [vmem:[%s6695_s7 + $0x24] ss:$16 sps:$4 sm:$0xff]   ;;  %v4962_v47 = vld [vmem:[%s6695_s7 + $0x2c] ss:$16 sps:$4 sm:$0xff]  }
 0x22c   : > { %2489 = vmatpush1.bf16.msra.mxu0 %v4873_v48  ;;  %2571 = vmatpush1.bf16.msra.mxu1 %v4876_v49  ;;  %v4957_v48 = vld [vmem:[%s6695_s7 + $0x20] ss:$16 sps:$4 sm:$0xff]   ;;  %v4960_v49 = vld [vmem:[%s6695_s7 + $0x28] ss:$16 sps:$4 sm:$0xff]  }
 0x22d   : > { %2490 = vmatprep.subr.bf16.mxu0 %v4881_v50  ;;  %2572 = vmatprep.subr.bf16.mxu1 %v4884_v51  ;;  %v4965_v50 = vld [vmem:[%s6695_s7 + $0x44] ss:$16 sps:$4 sm:$0xff]   ;;  %v4968_v51 = vld [vmem:[%s6695_s7 + $0x4c] ss:$16 sps:$4 sm:$0xff]  }
 0x230   : > { %2491 = vmatpush1.bf16.msra.mxu0 %v4879_v53  ;;  %2573 = vmatpush1.bf16.msra.mxu1 %v4882_v55  ;;  %v4963_v53 = vld [vmem:[%s6695_s7 + $0x40] ss:$16 sps:$4 sm:$0xff]   ;;  %v4966_v55 = vld [vmem:[%s6695_s7 + $0x48] ss:$16 sps:$4 sm:$0xff]  }
 0x231   : > { %2492 = vmatprep.subr.bf16.mxu0 %v4887_v56  ;;  %2574 = vmatprep.subr.bf16.mxu1 %v4890_v57  ;;  %v4971_v56 = vld [vmem:[%s6695_s7 + $0x64] ss:$16 sps:$4 sm:$0xff]   ;;  %v4974_v57 = vld [vmem:[%s6695_s7 + $0x6c] ss:$16 sps:$4 sm:$0xff]  }
 0x234   : > { %2493 = vmatpush1.bf16.msra.mxu0 %v4885_v58  ;;  %2575 = vmatpush1.bf16.msra.mxu1 %v4888_v38  ;;  %v4969_v58 = vld [vmem:[%s6695_s7 + $0x60] ss:$16 sps:$4 sm:$0xff]   ;;  %v4972_v38 = vld [vmem:[%s6695_s7 + $0x68] ss:$16 sps:$4 sm:$0xff]  }
 0x235   : > { %2494 = vmatprep.subr.bf16.mxu0 %v4893_v59  ;;  %2576 = vmatprep.subr.bf16.mxu1 %v4896_v60  ;;  %v4977_v59 = vld [vmem:[%s6695_s7 + $0x84] ss:$16 sps:$4 sm:$0xff]   ;;  %v4980_v60 = vld [vmem:[%s6695_s7 + $0x8c] ss:$16 sps:$4 sm:$0xff]  }
 0x238   : > { %2495 = vmatpush1.bf16.msra.mxu0 %v4891_v61  ;;  %2577 = vmatpush1.bf16.msra.mxu1 %v4894_v40  ;;  %v4975_v61 = vld [vmem:[%s6695_s7 + $0x80] ss:$16 sps:$4 sm:$0xff]   ;;  %v4978_v40 = vld [vmem:[%s6695_s7 + $0x88] ss:$16 sps:$4 sm:$0xff]  }
 0x239   : > { %2496 = vmatprep.subr.bf16.mxu0 %v4899_v62  ;;  %2578 = vmatprep.subr.bf16.mxu1 %v4902_v63  ;;  %v4983_v62 = vld [vmem:[%s6695_s7 + $0xa4] ss:$16 sps:$4 sm:$0xff]   ;;  %v4986_v63 = vld [vmem:[%s6695_s7 + $0xac] ss:$16 sps:$4 sm:$0xff]  }
 0x23c   : > { %2497 = vmatpush1.bf16.msra.mxu0 %v4897_v1  ;;  %2579 = vmatpush1.bf16.msra.mxu1 %v4900_v2  ;;  %v4981_v1 = vld [vmem:[%s6695_s7 + $0xa0] ss:$16 sps:$4 sm:$0xff]   ;;  %v4984_v2 = vld [vmem:[%s6695_s7 + $0xa8] ss:$16 sps:$4 sm:$0xff]  }
 0x23d   : > { %2498 = vmatprep.subr.bf16.mxu0 %v4905_v0  ;;  %2580 = vmatprep.subr.bf16.mxu1 %v4908_v3  ;;  %v4989_v0 = vld [vmem:[%s6695_s7 + $0xc4] ss:$16 sps:$4 sm:$0xff]   ;;  %v4992_v3 = vld [vmem:[%s6695_s7 + $0xcc] ss:$16 sps:$4 sm:$0xff]  }
 0x240   : > { %2499 = vmatpush1.bf16.msra.mxu0 %v4903_v4  ;;  %2581 = vmatpush1.bf16.msra.mxu1 %v4906_v5  ;;  %v4987_v4 = vld [vmem:[%s6695_s7 + $0xc0] ss:$16 sps:$4 sm:$0xff]   ;;  %v4990_v5 = vld [vmem:[%s6695_s7 + $0xc8] ss:$16 sps:$4 sm:$0xff]  }
 0x241   : > { %2500 = vmatprep.subr.bf16.mxu0 %v4911_v6  ;;  %2582 = vmatprep.subr.bf16.mxu1 %v4914_v7  ;;  %v4995_v6 = vld [vmem:[%s6695_s7 + $0xe4] ss:$16 sps:$4 sm:$0xff]   ;;  %v4998_v7 = vld [vmem:[%s6695_s7 + $0xec] ss:$16 sps:$4 sm:$0xff]  }
 0x244   : > { %2501 = vmatpush1.bf16.msra.mxu0 %v4909_v8  ;;  %2583 = vmatpush1.bf16.msra.mxu1 %v4912_v9  ;;  %v4993_v8 = vld [vmem:[%s6695_s7 + $0xe0] ss:$16 sps:$4 sm:$0xff]   ;;  %v4996_v9 = vld [vmem:[%s6695_s7 + $0xe8] ss:$16 sps:$4 sm:$0xff]  }
 0x245   : > { %2502 = vmatprep.subr.bf16.mxu0 %v4917_v10  ;;  %2584 = vmatprep.subr.bf16.mxu1 %v4920_v12  ;;  %v5001_v10 = vld [vmem:[%s6695_s7 + $0x104] ss:$16 sps:$4 sm:$0xff]   ;;  %v5004_v12 = vld [vmem:[%s6695_s7 + $0x10c] ss:$16 sps:$4 sm:$0xff]  }
 0x248   : > { %2503 = vmatpush1.bf16.msra.mxu0 %v4915_v13  ;;  %2585 = vmatpush1.bf16.msra.mxu1 %v4918_v14  ;;  %v4999_v13 = vld [vmem:[%s6695_s7 + $0x100] ss:$16 sps:$4 sm:$0xff]   ;;  %v5002_v14 = vld [vmem:[%s6695_s7 + $0x108] ss:$16 sps:$4 sm:$0xff]  }
 0x249   : > { %2504 = vmatprep.subr.bf16.mxu0 %v4923_v15  ;;  %2586 = vmatprep.subr.bf16.mxu1 %v4926_v17  ;;  %v5007_v15 = vld [vmem:[%s6695_s7 + $0x124] ss:$16 sps:$4 sm:$0xff]   ;;  %v5010_v17 = vld [vmem:[%s6695_s7 + $0x12c] ss:$16 sps:$4 sm:$0xff]  }
 0x24c   : > { %2505 = vmatpush1.bf16.msra.mxu0 %v4921_v18  ;;  %2587 = vmatpush1.bf16.msra.mxu1 %v4924_v19  ;;  %v5005_v18 = vld [vmem:[%s6695_s7 + $0x120] ss:$16 sps:$4 sm:$0xff]   ;;  %v5008_v19 = vld [vmem:[%s6695_s7 + $0x128] ss:$16 sps:$4 sm:$0xff]  }
 0x24d   : > { %2506 = vmatprep.subr.bf16.mxu0 %v4929_v20  ;;  %2588 = vmatprep.subr.bf16.mxu1 %v4932_v21  ;;  %v5013_v20 = vld [vmem:[%s6695_s7 + $0x144] ss:$16 sps:$4 sm:$0xff]   ;;  %v5016_v21 = vld [vmem:[%s6695_s7 + $0x14c] ss:$16 sps:$4 sm:$0xff]  }
 0x250   : > { %2507 = vmatpush1.bf16.msra.mxu0 %v4927_v22  ;;  %2589 = vmatpush1.bf16.msra.mxu1 %v4930_v23  ;;  %v5011_v22 = vld [vmem:[%s6695_s7 + $0x140] ss:$16 sps:$4 sm:$0xff]   ;;  %v5014_v23 = vld [vmem:[%s6695_s7 + $0x148] ss:$16 sps:$4 sm:$0xff]  }
 0x251   : > { %2508 = vmatprep.subr.bf16.mxu0 %v4935_v24  ;;  %2590 = vmatprep.subr.bf16.mxu1 %v4938_v25  ;;  %v5019_v24 = vld [vmem:[%s6695_s7 + $0x164] ss:$16 sps:$4 sm:$0xff]   ;;  %v5022_v25 = vld [vmem:[%s6695_s7 + $0x16c] ss:$16 sps:$4 sm:$0xff]  }
 0x254   : > { %2509 = vmatpush1.bf16.msra.mxu0 %v4933_v26  ;;  %2591 = vmatpush1.bf16.msra.mxu1 %v4936_v27  ;;  %v5017_v26 = vld [vmem:[%s6695_s7 + $0x160] ss:$16 sps:$4 sm:$0xff]   ;;  %v5020_v27 = vld [vmem:[%s6695_s7 + $0x168] ss:$16 sps:$4 sm:$0xff]  }
 0x255   : > { %2510 = vmatprep.subr.bf16.mxu0 %v4941_v29  ;;  %2592 = vmatprep.subr.bf16.mxu1 %v4944_v30  ;;  %v5028_v29 = vld [vmem:[%s6695_s7 + $0x18c] ss:$16 sps:$4 sm:$0xff]   ;;  %v5023_v30 = vld [vmem:[%s6695_s7 + $0x180] ss:$16 sps:$4 sm:$0xff]  }
 0x258   : > { %2511 = vmatpush1.bf16.msra.mxu0 %v4939_v31  ;;  %2593 = vmatpush1.bf16.msra.mxu1 %v4942_v11  ;;  %v5026_v31 = vld [vmem:[%s6695_s7 + $0x188] ss:$16 sps:$4 sm:$0xff]   ;;  %v5031_v11 = vld [vmem:[%s6695_s7 + $0x1a4] ss:$16 sps:$4 sm:$0xff]  }
 0x259   : > { %2512 = vmatprep.subr.bf16.mxu0 %v4947_v33  ;;  %2594 = vmatprep.subr.bf16.mxu1 %v4950_v34  ;;  %v5029_v33 = vld [vmem:[%s6695_s7 + $0x1a0] ss:$16 sps:$4 sm:$0xff]   ;;  %v5032_v34 = vld [vmem:[%s6695_s7 + $0x1a8] ss:$16 sps:$4 sm:$0xff]  }
 0x25c   : > { %2513 = vmatpush1.bf16.msra.mxu0 %v4945_v35  ;;  %2595 = vmatpush1.bf16.msra.mxu1 %v4948_v16  ;;  %v5037_v35 = vld [vmem:[%s6695_s7 + $0x1c4] ss:$16 sps:$4 sm:$0xff]   ;;  %v5040_v16 = vld [vmem:[%s6695_s7 + $0x1cc] ss:$16 sps:$4 sm:$0xff]  }
 0x25d   : > { %3403 = vmatprep.subr.bf16.mxu0 %v4953_v37  ;;  %3485 = vmatprep.subr.bf16.mxu1 %v4956_v42  ;;  %v5038_v37 = vld [vmem:[%s6695_s7 + $0x1c8] ss:$16 sps:$4 sm:$0xff]   ;;  %v5043_v42 = vld [vmem:[%s6695_s7 + $0x1e4] ss:$16 sps:$4 sm:$0xff]  }
 0x25f   : > { %2515 = vmatmul.mubr.bf16.vlgmr.msra.gmra.mrb[8].mxu0 %v1649_v45  ;;  %2597 = vmatmul.mubr.bf16.vlgmr.msra.gmra.mrb[8].mxu1 %v1649_v45  ;;  %v5044_v45 = vld [vmem:[%s6695_s7 + $0x1e8] ss:$16 sps:$4 sm:$0xff]  }
 0x260   : > { %3404 = vmatpush1.bf16.msra.mxu0 %v4951_v43  ;;  %3486 = vmatpush1.bf16.msra.mxu1 %v4954_v44  ;;  %v5046_v43 = vld [vmem:[%s6695_s7 + $0x1ec] ss:$16 sps:$4 sm:$0xff]   ;;  %v5041_v44 = vld [vmem:[%s6695_s7 + $0x1e0] ss:$16 sps:$4 sm:$0xff]  }
 0x261   : > { %3405 = vmatprep.subr.bf16.mxu0 %v4959_v46  ;;  %3487 = vmatprep.subr.bf16.mxu1 %v4962_v47  ;;  %v5049_v46 = vld [vmem:[%s6695_s7 + $0x204] ss:$16 sps:$4 sm:$0xff]   ;;  %v5052_v47 = vld [vmem:[%s6695_s7 + $0x20c] ss:$16 sps:$4 sm:$0xff]  }
 0x264   : > { %3406 = vmatpush1.bf16.msra.mxu0 %v4957_v48  ;;  %3488 = vmatpush1.bf16.msra.mxu1 %v4960_v49  ;;  %v6375_v48 = vld [vmem:[%s6694_s6] sm:$0xf] }
 0x265   : > { %3407 = vmatprep.subr.bf16.mxu0 %v4965_v50  ;;  %3489 = vmatprep.subr.bf16.mxu1 %v4968_v51  ;;  %v1784_v49 = vrot.slane %v6375_v48, %v5561_v39  ;;  %v1788_v50 = vrot.slane %v6375_v48, %v5569_v41  ;;  %v1796_v51 = vrot.slane %v6375_v48, %v5576_v52 }
 0x268   : > { %3408 = vmatpush1.bf16.msra.mxu0 %v4963_v53  ;;  %3490 = vmatpush1.bf16.msra.mxu1 %v4966_v55 }
 0x269   : > { %3409 = vmatprep.subr.bf16.mxu0 %v4971_v56  ;;  %3491 = vmatprep.subr.bf16.mxu1 %v4974_v57 }
 0x26c   : > { %3410 = vmatpush1.bf16.msra.mxu0 %v4969_v58  ;;  %3492 = vmatpush1.bf16.msra.mxu1 %v4972_v38 }
 0x26d   : > { %3411 = vmatprep.subr.bf16.mxu0 %v4977_v59  ;;  %3493 = vmatprep.subr.bf16.mxu1 %v4980_v60 }
 0x270   : > { %3412 = vmatpush1.bf16.msra.mxu0 %v4975_v61  ;;  %3494 = vmatpush1.bf16.msra.mxu1 %v4978_v40 }
 0x271   : > { %3413 = vmatprep.subr.bf16.mxu0 %v4983_v62  ;;  %3495 = vmatprep.subr.bf16.mxu1 %v4986_v63 }
 0x274   : > { %3414 = vmatpush1.bf16.msra.mxu0 %v4981_v1  ;;  %3496 = vmatpush1.bf16.msra.mxu1 %v4984_v2 }
 0x275   : > { %3415 = vmatprep.subr.bf16.mxu0 %v4989_v0  ;;  %3497 = vmatprep.subr.bf16.mxu1 %v4992_v3  ;;  %v5047_v3 = vld [vmem:[%s6695_s7 + $0x200] ss:$16 sps:$4 sm:$0xff]  }
 0x278   : > { %3416 = vmatpush1.bf16.msra.mxu0 %v4987_v4  ;;  %3498 = vmatpush1.bf16.msra.mxu1 %v4990_v5  ;;  %v5050_v4 = vld [vmem:[%s6695_s7 + $0x208] ss:$16 sps:$4 sm:$0xff]  }
 0x279   : > { %3417 = vmatprep.subr.bf16.mxu0 %v4995_v6  ;;  %3499 = vmatprep.subr.bf16.mxu1 %v4998_v7  ;;  %v5055_v6 = vld [vmem:[%s6695_s7 + $0x224] ss:$16 sps:$4 sm:$0xff]   ;;  %v5058_v7 = vld [vmem:[%s6695_s7 + $0x22c] ss:$16 sps:$4 sm:$0xff]  }
 0x27c   : > { %3418 = vmatpush1.bf16.msra.mxu0 %v4993_v8  ;;  %3500 = vmatpush1.bf16.msra.mxu1 %v4996_v9  ;;  %v5053_v9 = vld [vmem:[%s6695_s7 + $0x220] ss:$16 sps:$4 sm:$0xff]  }
 0x27d   : > { %3419 = vmatprep.subr.bf16.mxu0 %v5001_v10  ;;  %3501 = vmatprep.subr.bf16.mxu1 %v5004_v12  ;;  %v5056_v10 = vld [vmem:[%s6695_s7 + $0x228] ss:$16 sps:$4 sm:$0xff]   ;;  %v5061_v12 = vld [vmem:[%s6695_s7 + $0x244] ss:$16 sps:$4 sm:$0xff]  }
 0x280   : > { %3420 = vmatpush1.bf16.msra.mxu0 %v4999_v13  ;;  %3502 = vmatpush1.bf16.msra.mxu1 %v5002_v14  ;;  %v5064_v13 = vld [vmem:[%s6695_s7 + $0x24c] ss:$16 sps:$4 sm:$0xff]   ;;  %v5059_v14 = vld [vmem:[%s6695_s7 + $0x240] ss:$16 sps:$4 sm:$0xff]  }
 0x281   : > { %3421 = vmatprep.subr.bf16.mxu0 %v5007_v15  ;;  %3503 = vmatprep.subr.bf16.mxu1 %v5010_v17  ;;  %v5062_v15 = vld [vmem:[%s6695_s7 + $0x248] ss:$16 sps:$4 sm:$0xff]   ;;  %v5067_v17 = vld [vmem:[%s6695_s7 + $0x264] ss:$16 sps:$4 sm:$0xff]  }
 0x284   : > { %3422 = vmatpush1.bf16.msra.mxu0 %v5005_v18  ;;  %3504 = vmatpush1.bf16.msra.mxu1 %v5008_v19  ;;  %v5070_v18 = vld [vmem:[%s6695_s7 + $0x26c] ss:$16 sps:$4 sm:$0xff]   ;;  %v5065_v19 = vld [vmem:[%s6695_s7 + $0x260] ss:$16 sps:$4 sm:$0xff]  }
 0x285   : > { %3423 = vmatprep.subr.bf16.mxu0 %v5013_v20  ;;  %3505 = vmatprep.subr.bf16.mxu1 %v5016_v21  ;;  %v5068_v20 = vld [vmem:[%s6695_s7 + $0x268] ss:$16 sps:$4 sm:$0xff]   ;;  %v5073_v21 = vld [vmem:[%s6695_s7 + $0x284] ss:$16 sps:$4 sm:$0xff]  }
 0x288   : > { %3424 = vmatpush1.bf16.msra.mxu0 %v5011_v22  ;;  %3506 = vmatpush1.bf16.msra.mxu1 %v5014_v23  ;;  %v5076_v22 = vld [vmem:[%s6695_s7 + $0x28c] ss:$16 sps:$4 sm:$0xff]   ;;  %v5071_v23 = vld [vmem:[%s6695_s7 + $0x280] ss:$16 sps:$4 sm:$0xff]  }
 0x289   : > { %3425 = vmatprep.subr.bf16.mxu0 %v5019_v24  ;;  %3507 = vmatprep.subr.bf16.mxu1 %v5022_v25  ;;  %v5074_v24 = vld [vmem:[%s6695_s7 + $0x288] ss:$16 sps:$4 sm:$0xff]   ;;  %v5079_v25 = vld [vmem:[%s6695_s7 + $0x2a4] ss:$16 sps:$4 sm:$0xff]  }
 0x28c   : > { %3426 = vmatpush1.bf16.msra.mxu0 %v5017_v26  ;;  %3508 = vmatpush1.bf16.msra.mxu1 %v5020_v27  ;;  %v5082_v26 = vld [vmem:[%s6695_s7 + $0x2ac] ss:$16 sps:$4 sm:$0xff]   ;;  %v5077_v27 = vld [vmem:[%s6695_s7 + $0x2a0] ss:$16 sps:$4 sm:$0xff]  }
 0x28d   : > { %3427 = vmatprep.subr.bf16.mxu0 %v5025_v28  ;;  %3509 = vmatprep.subr.bf16.mxu1 %v5028_v29  ;;  %v5080_v28 = vld [vmem:[%s6695_s7 + $0x2a8] ss:$16 sps:$4 sm:$0xff]   ;;  %v5085_v29 = vld [vmem:[%s6695_s7 + $0x2c4] ss:$16 sps:$4 sm:$0xff]  }
 0x290   : > { %3428 = vmatpush1.bf16.msra.mxu0 %v5023_v30  ;;  %3510 = vmatpush1.bf16.msra.mxu1 %v5026_v31  ;;  %v5088_v30 = vld [vmem:[%s6695_s7 + $0x2cc] ss:$16 sps:$4 sm:$0xff]   ;;  %v5083_v31 = vld [vmem:[%s6695_s7 + $0x2c0] ss:$16 sps:$4 sm:$0xff]  }
 0x291   : > { %3429 = vmatprep.subr.bf16.mxu0 %v5031_v11  ;;  %3511 = vmatprep.subr.bf16.mxu1 %v5034_v32  ;;  %v5086_v11 = vld [vmem:[%s6695_s7 + $0x2c8] ss:$16 sps:$4 sm:$0xff]   ;;  %v5091_v32 = vld [vmem:[%s6695_s7 + $0x2e4] ss:$16 sps:$4 sm:$0xff]  }
 0x294   : > { %3430 = vmatpush1.bf16.msra.mxu0 %v5029_v33  ;;  %3512 = vmatpush1.bf16.msra.mxu1 %v5032_v34  ;;  %v5094_v33 = vld [vmem:[%s6695_s7 + $0x2ec] ss:$16 sps:$4 sm:$0xff]   ;;  %v5089_v34 = vld [vmem:[%s6695_s7 + $0x2e0] ss:$16 sps:$4 sm:$0xff]  }
 0x295   : > { %3431 = vmatprep.subr.bf16.mxu0 %v5037_v35  ;;  %3513 = vmatprep.subr.bf16.mxu1 %v5040_v16  ;;  %v5092_v35 = vld [vmem:[%s6695_s7 + $0x2e8] ss:$16 sps:$4 sm:$0xff]   ;;  %v5097_v16 = vld [vmem:[%s6695_s7 + $0x304] ss:$16 sps:$4 sm:$0xff]  }
 0x298   : > { %3432 = vmatpush1.bf16.msra.mxu0 %v5035_v36  ;;  %3514 = vmatpush1.bf16.msra.mxu1 %v5038_v37  ;;  %v5100_v36 = vld [vmem:[%s6695_s7 + $0x30c] ss:$16 sps:$4 sm:$0xff]   ;;  %v5095_v37 = vld [vmem:[%s6695_s7 + $0x300] ss:$16 sps:$4 sm:$0xff]  }
 0x299   : > { %3433 = vmatprep.subr.bf16.mxu0 %v5043_v42  ;;  %3515 = vmatprep.subr.bf16.mxu1 %v5046_v43  ;;  %v5098_v42 = vld [vmem:[%s6695_s7 + $0x308] ss:$16 sps:$4 sm:$0xff]   ;;  %v5103_v43 = vld [vmem:[%s6695_s7 + $0x324] ss:$16 sps:$4 sm:$0xff]  }
 0x29c   : > { %3434 = vmatpush1.bf16.msra.mxu0 %v5041_v44  ;;  %3516 = vmatpush1.bf16.msra.mxu1 %v5044_v45  ;;  %v5106_v44 = vld [vmem:[%s6695_s7 + $0x32c] ss:$16 sps:$4 sm:$0xff]   ;;  %v5101_v45 = vld [vmem:[%s6695_s7 + $0x320] ss:$16 sps:$4 sm:$0xff]  }
 0x29d   : > { %3444 = vmatprep.subr.bf16.mxu0 %v5049_v46  ;;  %3526 = vmatprep.subr.bf16.mxu1 %v5052_v47  ;;  %v5104_v46 = vld [vmem:[%s6695_s7 + $0x328] ss:$16 sps:$4 sm:$0xff]   ;;  %v5109_v47 = vld [vmem:[%s6695_s7 + $0x344] ss:$16 sps:$4 sm:$0xff]  }
 0x332   : > { %v2516_v53 = vpop.f32.mrb[8].mxu0  ;;  %v6383_v55 = vpop.f32.mrb[8].mxu1 }
 0x333   : > { %v4478_v56 = vadd.f32 %v2516_v53, %v1784_v49  ;;  %v2518_v57 = vpop.f32.mrb[9].mxu0  ;;  %v2600_v58 = vpop.f32.mrb[9].mxu1  ;;  %v5112_v49 = vld [vmem:[%s6695_s7 + $0x34c] ss:$16 sps:$4 sm:$0xff]   ;;  %v5115_v53 = vld [vmem:[%s6695_s7 + $0x364] ss:$16 sps:$4 sm:$0xff]  }
 0x334   : > { %v4479_v38 = vadd.f32 %v2518_v57, %v1788_v50  ;;  %v4481_v59 = vadd.f32 %v2600_v58, %v1796_v51  ;;  %v2520_v60 = vpop.f32.mrb[10].mxu0  ;;  %v2602_v61 = vpop.f32.mrb[10].mxu1  ;;  %v5107_v50 = vld [vmem:[%s6695_s7 + $0x340] ss:$16 sps:$4 sm:$0xff]   ;;  %v5110_v51 = vld [vmem:[%s6695_s7 + $0x348] ss:$16 sps:$4 sm:$0xff]  }
 0x335   : > { %v2605_v40 = vmax.f32 %v4478_v56, 0.0  ;;  %v2521_v62 = vpop.f32.mrb[11].mxu0  ;;  %v2603_v63 = vpop.f32.mrb[11].mxu1  ;;  %v5118_v56 = vld [vmem:[%s6695_s7 + $0x36c] ss:$16 sps:$4 sm:$0xff]  }
 0x336   : > { %v2606_v1 = vmax.f32 %v4479_v38, 0.0  ;;  %v2608_v2 = vmax.f32 %v4481_v59, 0.0  ;;  %v5113_v57 = vld [vmem:[%s6695_s7 + $0x360] ss:$16 sps:$4 sm:$0xff]   ;;  %v5116_v58 = vld [vmem:[%s6695_s7 + $0x368] ss:$16 sps:$4 sm:$0xff]  }
 0x337   : > { %v2609_v5 = vpack.c.bf16 %v2605_v40, %v2605_v40  ;;  %v5121_v38 = vld [vmem:[%s6695_s7 + $0x384] ss:$16 sps:$4 sm:$0xff]   ;;  %v5124_v59 = vld [vmem:[%s6695_s7 + $0x38c] ss:$16 sps:$4 sm:$0xff]   ;;  %v5119_v60 = vld [vmem:[%s6695_s7 + $0x380] ss:$16 sps:$4 sm:$0xff]  }
 0x338   : > { %v2610_v0 = vpack.c.bf16 %v2606_v1, %v2606_v1  ;;  %v2612_v8 = vpack.c.bf16 %v2608_v2, %v2608_v2  ;;  %v5122_v61 = vld [vmem:[%s6695_s7 + $0x388] ss:$16 sps:$4 sm:$0xff]   ;;  %v5127_v40 = vld [vmem:[%s6695_s7 + $0x3a4] ss:$16 sps:$4 sm:$0xff]   ;;  %v5130_v62 = vld [vmem:[%s6695_s7 + $0x3ac] ss:$16 sps:$4 sm:$0xff]   ;;  %v1792_v2 = vrot.slane %v6375_v48, %v5733_v54 }
 0x339   : > { %v5125_v63 = vld [vmem:[%s6695_s7 + $0x3a0] ss:$16 sps:$4 sm:$0xff]   ;;  %v5128_v1 = vld [vmem:[%s6695_s7 + $0x3a8] ss:$16 sps:$4 sm:$0xff]  }
 0x33a   : > { %3435 = vmatprep.mubr.bf16.mxu0 %v2610_v0  ;;  %3517 = vmatprep.mubr.bf16.mxu1 %v2610_v0  ;;  %v5133_v0 = vld [vmem:[%s6695_s7 + $0x3c4] ss:$16 sps:$4 sm:$0xff]   ;;  %v5134_v48 = vld [vmem:[%s6695_s7 + $0x3c8] ss:$16 sps:$4 sm:$0xff]  }
 0x33b   : > { %3436 = vmatmul.mubr.bf16.vlgmr.msra.gmra.mrb[12].mxu0 %v2609_v5  ;;  %3518 = vmatmul.mubr.bf16.vlgmr.msra.gmra.mrb[12].mxu1 %v2609_v5  ;;  %v4480_v5 = vadd.f32 %v6383_v55, %v1792_v2  ;;  %v5140_v55 = vld [vmem:[%s6695_s7 + $0x3e8] ss:$16 sps:$4 sm:$0xff]  }
 0x33c   : > { %3445 = vmatpush1.bf16.msra.mxu0 %v5047_v3  ;;  %3527 = vmatpush1.bf16.msra.mxu1 %v5050_v4  ;;  %v5136_v3 = vld [vmem:[%s6695_s7 + $0x3cc] ss:$16 sps:$4 sm:$0xff]   ;;  %v5131_v4 = vld [vmem:[%s6695_s7 + $0x3c0] ss:$16 sps:$4 sm:$0xff]  }
 0x33d   : > { %3476 = vmatprep.mubr.bf16.mxu0 %v2612_v8  ;;  %3558 = vmatprep.mubr.bf16.mxu1 %v2612_v8  ;;  %v5137_v8 = vld [vmem:[%s6695_s7 + $0x3e0] ss:$16 sps:$4 sm:$0xff]  }
 0x33e   : > { %3446 = vmatprep.subr.bf16.mxu0 %v5055_v6  ;;  %3528 = vmatprep.subr.bf16.mxu1 %v5058_v7  ;;  %v5139_v6 = vld [vmem:[%s6695_s7 + $0x3e4] ss:$16 sps:$4 sm:$0xff]   ;;  %v5142_v7 = vld [vmem:[%s6695_s7 + $0x3ec] ss:$16 sps:$4 sm:$0xff]  }
 0x340   : > { %3447 = vmatpush1.bf16.msra.mxu0 %v5053_v9  ;;  %3529 = vmatpush1.bf16.msra.mxu1 %v5056_v10  ;;  %v2607_v9 = vmax.f32 %v4480_v5, 0.0  ;;  %v5143_v10 = vld [vmem:[%s6697_s9 + $0x40] sm:$0xff]  }
 0x341   : > { %3448 = vmatprep.subr.bf16.mxu0 %v5061_v12  ;;  %3530 = vmatprep.subr.bf16.mxu1 %v5064_v13  ;;  %v5144_v12 = vld [vmem:[%s6697_s9 + $0xc0] sm:$0xff]  }
 0x342   : > { %v5145_v13 = vld [vmem:[%s6697_s9] sm:$0xff]  }
 0x344   : > { %3449 = vmatpush1.bf16.msra.mxu0 %v5059_v14  ;;  %3531 = vmatpush1.bf16.msra.mxu1 %v5062_v15  ;;  %v5146_v14 = vld [vmem:[%s6697_s9 + $0x80] sm:$0xff]   ;;  %v2611_v15 = vpack.c.bf16 %v2607_v9, %v2607_v9 }
 0x345   : > { %3450 = vmatprep.subr.bf16.mxu0 %v5067_v17  ;;  %3532 = vmatprep.subr.bf16.mxu1 %v5070_v18  ;;  %v5147_v17 = vld [vmem:[%s6697_s9 + $0x48] sm:$0xff]  }
 0x346   : > { %v5148_v18 = vld [vmem:[%s6697_s9 + $0xc8] sm:$0xff]  }
 0x348   : > { %3451 = vmatpush1.bf16.msra.mxu0 %v5065_v19  ;;  %3533 = vmatpush1.bf16.msra.mxu1 %v5068_v20  ;;  %v5149_v19 = vld [vmem:[%s6697_s9 + $0x8] sm:$0xff]  }
 0x349   : > { %3452 = vmatprep.subr.bf16.mxu0 %v5073_v21  ;;  %3534 = vmatprep.subr.bf16.mxu1 %v5076_v22  ;;  %v5150_v20 = vld [vmem:[%s6697_s9 + $0x88] sm:$0xff]   ;;  %v5151_v21 = vld [vmem:[%s6697_s9 + $0x50] sm:$0xff]  }
 0x34a   : > { %v5152_v22 = vld [vmem:[%s6697_s9 + $0xd0] sm:$0xff]  }
 0x34c   : > { %3453 = vmatpush1.bf16.msra.mxu0 %v5071_v23  ;;  %3535 = vmatpush1.bf16.msra.mxu1 %v5074_v24  ;;  %v5153_v23 = vld [vmem:[%s6697_s9 + $0x10] sm:$0xff]  }
 0x34d   : > { %3454 = vmatprep.subr.bf16.mxu0 %v5079_v25  ;;  %3536 = vmatprep.subr.bf16.mxu1 %v5082_v26  ;;  %v5154_v24 = vld [vmem:[%s6697_s9 + $0x90] sm:$0xff]   ;;  %v5155_v25 = vld [vmem:[%s6697_s9 + $0x58] sm:$0xff]  }
 0x34e   : > { %v5156_v26 = vld [vmem:[%s6697_s9 + $0xd8] sm:$0xff]  }
 0x350   : > { %3455 = vmatpush1.bf16.msra.mxu0 %v5077_v27  ;;  %3537 = vmatpush1.bf16.msra.mxu1 %v5080_v28  ;;  %v5157_v27 = vld [vmem:[%s6697_s9 + $0x18] sm:$0xff]  }
 0x351   : > { %3456 = vmatprep.subr.bf16.mxu0 %v5085_v29  ;;  %3538 = vmatprep.subr.bf16.mxu1 %v5088_v30  ;;  %v5158_v28 = vld [vmem:[%s6697_s9 + $0x98] sm:$0xff]   ;;  %v5159_v29 = vld [vmem:[%s6697_s9 + $0x60] sm:$0xff]  }
 0x352   : > { %v5160_v30 = vld [vmem:[%s6697_s9 + $0xe0] sm:$0xff]  }
 0x354   : > { %3457 = vmatpush1.bf16.msra.mxu0 %v5083_v31  ;;  %3539 = vmatpush1.bf16.msra.mxu1 %v5086_v11  ;;  %v5161_v31 = vld [vmem:[%s6697_s9 + $0x20] sm:$0xff]  }
 0x355   : > { %3458 = vmatprep.subr.bf16.mxu0 %v5091_v32  ;;  %3540 = vmatprep.subr.bf16.mxu1 %v5094_v33  ;;  %v5162_v11 = vld [vmem:[%s6697_s9 + $0xa0] sm:$0xff]   ;;  %v5163_v32 = vld [vmem:[%s6697_s9 + $0x68] sm:$0xff]  }
 0x356   : > { %v5164_v33 = vld [vmem:[%s6697_s9 + $0xe8] sm:$0xff]  }
 0x358   : > { %3459 = vmatpush1.bf16.msra.mxu0 %v5089_v34  ;;  %3541 = vmatpush1.bf16.msra.mxu1 %v5092_v35  ;;  %v5165_v34 = vld [vmem:[%s6697_s9 + $0x28] sm:$0xff]  }
 0x359   : > { %3460 = vmatprep.subr.bf16.mxu0 %v5097_v16  ;;  %3542 = vmatprep.subr.bf16.mxu1 %v5100_v36  ;;  %v5166_v35 = vld [vmem:[%s6697_s9 + $0xa8] sm:$0xff]   ;;  %v5167_v16 = vld [vmem:[%s6697_s9 + $0x70] sm:$0xff]  }
 0x35a   : > { %v5168_v36 = vld [vmem:[%s6697_s9 + $0xf0] sm:$0xff]  }
 0x35c   : > { %3461 = vmatpush1.bf16.msra.mxu0 %v5095_v37  ;;  %3543 = vmatpush1.bf16.msra.mxu1 %v5098_v42  ;;  %v5169_v37 = vld [vmem:[%s6697_s9 + $0x30] sm:$0xff]  }
 0x35d   : > { %3462 = vmatprep.subr.bf16.mxu0 %v5103_v43  ;;  %3544 = vmatprep.subr.bf16.mxu1 %v5106_v44  ;;  %v5170_v42 = vld [vmem:[%s6697_s9 + $0xb0] sm:$0xff]   ;;  %v5171_v43 = vld [vmem:[%s6697_s9 + $0x78] sm:$0xff]  }
 0x35e   : > { %v5172_v44 = vld [vmem:[%s6697_s9 + $0xf8] sm:$0xff]  }
 0x360   : > { %3463 = vmatpush1.bf16.msra.mxu0 %v5101_v45  ;;  %3545 = vmatpush1.bf16.msra.mxu1 %v5104_v46  ;;  %v5173_v45 = vld [vmem:[%s6697_s9 + $0x38] sm:$0xff]  }
 0x361   : > { %3464 = vmatprep.subr.bf16.mxu0 %v5109_v47  ;;  %3546 = vmatprep.subr.bf16.mxu1 %v5112_v49  ;;  %v5174_v46 = vld [vmem:[%s6697_s9 + $0xb8] sm:$0xff]   ;;  %v2741_v47 = vld [vmem:[%s6696_s8] sm:$0xf] }
 0x362   : > { %v2746_v49 = vrot.slane %v2741_v47, %v5561_v39 }
 0x364   : > { %3465 = vmatpush1.bf16.msra.mxu0 %v5107_v50  ;;  %3547 = vmatpush1.bf16.msra.mxu1 %v5110_v51  ;;  %v2754_v50 = vrot.slane %v2741_v47, %v5733_v54  ;;  %v2750_v51 = vrot.slane %v2741_v47, %v5569_v41 }
 0x365   : > { %3466 = vmatprep.subr.bf16.mxu0 %v5115_v53  ;;  %3548 = vmatprep.subr.bf16.mxu1 %v5118_v56  ;;  %v2758_v53 = vrot.slane %v2741_v47, %v5576_v52 }
 0x368   : > { %3467 = vmatpush1.bf16.msra.mxu0 %v5113_v57  ;;  %3549 = vmatpush1.bf16.msra.mxu1 %v5116_v58 }
 0x369   : > { %3468 = vmatprep.subr.bf16.mxu0 %v5121_v38  ;;  %3550 = vmatprep.subr.bf16.mxu1 %v5124_v59 }
 0x36c   : > { %3469 = vmatpush1.bf16.msra.mxu0 %v5119_v60  ;;  %3551 = vmatpush1.bf16.msra.mxu1 %v5122_v61 }
 0x36d   : > { %3470 = vmatprep.subr.bf16.mxu0 %v5127_v40  ;;  %3552 = vmatprep.subr.bf16.mxu1 %v5130_v62 }
 0x370   : > { %3471 = vmatpush1.bf16.msra.mxu0 %v5125_v63  ;;  %3553 = vmatpush1.bf16.msra.mxu1 %v5128_v1 }
 0x371   : > { %3472 = vmatprep.subr.bf16.mxu0 %v5133_v0  ;;  %3554 = vmatprep.subr.bf16.mxu1 %v5136_v3 }
 0x374   : > { %3473 = vmatpush1.bf16.msra.mxu0 %v5131_v4  ;;  %3555 = vmatpush1.bf16.msra.mxu1 %v5134_v48 }
 0x375   : > { %3474 = vmatprep.subr.bf16.mxu0 %v5139_v6  ;;  %3556 = vmatprep.subr.bf16.mxu1 %v5142_v7  ;;  %v4395_v7 = vld [vmem:[%s6698_s10] ss:$0 sm:$0xff] }
 0x378   : > { %3475 = vmatpush1.bf16.msra.mxu0 %v5137_v8  ;;  %3557 = vmatpush1.bf16.msra.mxu1 %v5140_v55 }
 0x379   : > { %4430 = vmatprep.subr.bf16.mxu0 %v5143_v10  ;;  %4452 = vmatprep.subr.bf16.mxu1 %v5144_v12 }
 0x37b   : > { %3477 = vmatmul.mubr.bf16.vlgmr.msra.gmra.mrb[12].mxu0 %v2611_v15  ;;  %3559 = vmatmul.mubr.bf16.vlgmr.msra.gmra.mrb[12].mxu1 %v2611_v15 }
 0x37c   : > { %4431 = vmatpush3.bf16.msra.mxu0 %v5145_v13  ;;  %4453 = vmatpush3.bf16.msra.mxu1 %v5146_v14 }
 0x37d   : > { %4432 = vmatprep.subr.bf16.mxu0 %v5147_v17  ;;  %4454 = vmatprep.subr.bf16.mxu1 %v5148_v18 }
 0x380   : > { %4433 = vmatpush3.bf16.msra.mxu0 %v5149_v19  ;;  %4455 = vmatpush3.bf16.msra.mxu1 %v5150_v20 }
 0x381   : > { %4434 = vmatprep.subr.bf16.mxu0 %v5151_v21  ;;  %4456 = vmatprep.subr.bf16.mxu1 %v5152_v22 }
 0x384   : > { %4435 = vmatpush3.bf16.msra.mxu0 %v5153_v23  ;;  %4457 = vmatpush3.bf16.msra.mxu1 %v5154_v24 }
 0x385   : > { %4436 = vmatprep.subr.bf16.mxu0 %v5155_v25  ;;  %4458 = vmatprep.subr.bf16.mxu1 %v5156_v26 }
 0x388   : > { %4437 = vmatpush3.bf16.msra.mxu0 %v5157_v27  ;;  %4459 = vmatpush3.bf16.msra.mxu1 %v5158_v28 }
 0x389   : > { %4438 = vmatprep.subr.bf16.mxu0 %v5159_v29  ;;  %4460 = vmatprep.subr.bf16.mxu1 %v5160_v30 }
 0x38c   : > { %4439 = vmatpush3.bf16.msra.mxu0 %v5161_v31  ;;  %4461 = vmatpush3.bf16.msra.mxu1 %v5162_v11 }
 0x38d   : > { %4440 = vmatprep.subr.bf16.mxu0 %v5163_v32  ;;  %4462 = vmatprep.subr.bf16.mxu1 %v5164_v33 }
 0x390   : > { %4441 = vmatpush3.bf16.msra.mxu0 %v5165_v34  ;;  %4463 = vmatpush3.bf16.msra.mxu1 %v5166_v35 }
 0x391   : > { %4442 = vmatprep.subr.bf16.mxu0 %v5167_v16  ;;  %4464 = vmatprep.subr.bf16.mxu1 %v5168_v36 }
 0x394   : > { %4443 = vmatpush3.bf16.msra.mxu0 %v5169_v37  ;;  %4465 = vmatpush3.bf16.msra.mxu1 %v5170_v42 }
 0x395   : > { %4444 = vmatprep.subr.bf16.mxu0 %v5171_v43  ;;  %4466 = vmatprep.subr.bf16.mxu1 %v5172_v44 }
 0x398   : > { %4445 = vmatpush3.bf16.msra.mxu0 %v5173_v45  ;;  %4467 = vmatpush3.bf16.msra.mxu1 %v5174_v46 }
 0x44e   : > { %v3478_v56 = vpop.f32.mrb[12].mxu0  ;;  %v3560_v57 = vpop.f32.mrb[12].mxu1 }
 0x44f   : > { %v4482_v58 = vadd.f32 %v3478_v56, %v2746_v49  ;;  %v4484_v38 = vadd.f32 %v3560_v57, %v2754_v50  ;;  %v3480_v59 = vpop.f32.mrb[13].mxu0  ;;  %v3562_v60 = vpop.f32.mrb[13].mxu1 }
 0x450   : > { %v4483_v61 = vadd.f32 %v3480_v59, %v2750_v51  ;;  %v4485_v40 = vadd.f32 %v3562_v60, %v2758_v53  ;;  %v3482_v62 = vpop.f32.mrb[14].mxu0  ;;  %v3564_v63 = vpop.f32.mrb[14].mxu1 }
 0x451   : > { %v3567_v1 = vmax.f32 %v4482_v58, 0.0  ;;  %v3569_v2 = vmax.f32 %v4484_v38, 0.0  ;;  %v3483_v0 = vpop.f32.mrb[15].mxu0  ;;  %v3565_v39 = vpop.f32.mrb[15].mxu1 }
 0x452   : > { %v3568_v3 = vmax.f32 %v4483_v61, 0.0  ;;  %v3570_v54 = vmax.f32 %v4485_v40, 0.0 }
 0x453   : > { %v3571_v48 = vpack.c.bf16 %v3567_v1, %v3567_v1  ;;  %v3573_v52 = vpack.c.bf16 %v3569_v2, %v3569_v2 }
 0x454   : > { %v3572_v4 = vpack.c.bf16 %v3568_v3, %v3568_v3  ;;  %v3574_v41 = vpack.c.bf16 %v3570_v54, %v3570_v54 }
 0x456   : > { %3870 = vmatprep.mubr.bf16.mxu0 %v3572_v4  ;;  %3910 = vmatprep.mubr.bf16.mxu1 %v3574_v41 }
 0x457   : > { %3871 = vmatmul.mubr.bf16.vlgmr.msra.gmra.mrb[16].mxu0 %v3571_v48  ;;  %3911 = vmatmul.mubr.bf16.vlgmr.msra.gmra.mrb[16].mxu1 %v3573_v52 }
 0x52a   : > { %v4446_v5 = vpop.f32.mrb[16].mxu0  ;;  %v4468_v6 = vpop.f32.mrb[16].mxu1 }
 0x52b   : > { %v4447_v8 = vpop.f32.mrb[17].mxu0  ;;  %v4469_v55 = vpop.f32.mrb[17].mxu1 }
 0x52c   : > { %v4448_v9 = vadd.f32 %v4447_v8, %v4446_v5  ;;  %v4470_v10 = vadd.f32 %v4469_v55, %v4468_v6  ;;  %v4449_v12 = vpop.f32.mrb[18].mxu0  ;;  %v4471_v13 = vpop.f32.mrb[18].mxu1 }
 0x52d   : > { %v4450_v14 = vpop.f32.mrb[19].mxu0  ;;  %v4472_v15 = vpop.f32.mrb[19].mxu1 }
 0x52e   : > { %v3873_v17 = vadd.f32 %v4448_v9, %v4395_v7 }
 0x530   : > { %v3913_v18 = vadd.f32 %v4470_v10, %v3873_v17 }
 0x532   : > { %3918 = vst [vmem:[%s381_s14] sm:$0xff] %v3913_v18 }
 0x533 PF: > { %s21_s17 = sadd.s32 1, %s5181_s17  }
 0x534   : > { %p18_p4 = scmp.ge.s32.totalorder %s21_s17, 4  }
 0x536   :  { %20 = sbr.rel (!%p18_p4) target bundleno = 1 (0x1), region = 94 }

</bundles_post_ra>
